<compile_context>
chip_gen: v7x
topology: tpu7x:2x2x1
jax: 0.10.0
libtpu: 0.0.40
codegen_flags: <defaults>
</compile_context>

<pallas_src>
import jax
import jax.numpy as jnp
import numpy as np
from jax import lax
from jax.experimental import pallas as pl
from jax.experimental.pallas import tpu as pltpu

PREC_REF = lax.Precision.HIGHEST   # reference only; kernel uses DEFAULT precision


def encoder_kernel(xpair_ref,   # (T*Bp, 2E)  rows = [emb(t) | emb(T-1-t)], batch padded to Bp
                   wih_ref,     # (2E, 6Hp)   fused/padded input weights
                   whh_ref,     # (2Hp, 6Hp)  fused/padded recurrent weights (block-diag)
                   gxb_ref,     # (1, 6Hp)    b_ih(all gates) + b_hh(r,z) fused bias
                   bhn_ref,     # (1, 2Hp)    b_hn (stays inside r*(.) per GRU semantics)
                   fcw_ref,     # (2Hp, Hdp)  fc weights, columns padded to Hdp
                   fcb_ref,     # (1, Hdp)
                   out_ref,     # (T, Bp, 2Hp) per-step fused hidden [h_fwd | h_bwd]
                   hid_ref,     # (Bp, Hdp)
                   gx_ref):     # scratch (T*Bp, 6Hp)
    T, Bp, Hp2 = out_ref.shape
    Hp = Hp2 // 2

    # One-shot input projection for both directions and every time step
    # (all input-gate biases + recurrent r/z biases already folded in).
    # Off the serial path; default precision = single bf16 MXU pass, f32 acc.
    gx_ref[...] = (jnp.dot(xpair_ref[...], wih_ref[...],
                           preferred_element_type=jnp.float32)
                   + gxb_ref[...])

    # Hoisted once: JAX does not CSE broadcast_in_dim inside loops.
    bhn = jnp.broadcast_to(bhn_ref[...], (Bp, Hp2))

    # Fused hidden state [h_fwd(Hp) | h_bwd(Hp)]; padded lanes stay exactly 0
    # (n = tanh(0) = 0 and z*h_old = 0 there), which keeps the block-diag math exact.
    h = jnp.zeros((Bp, Hp2), jnp.float32)

    # T is static and small -> fully unrolled; each step is ONE single-pass MXU
    # matmul plus lane-aligned (128-wide) gate slices and one dense (8,128) store.
    for t in range(T):
        gx_t = gx_ref[pl.ds(t * Bp, Bp), :]        # static start, 8-sublane aligned
        gh = jnp.dot(h, whh_ref[...],              # serial critical path: 1 MXU pass
                     preferred_element_type=jnp.float32)
        r = jax.nn.sigmoid(gx_t[:, 0:Hp2] + gh[:, 0:Hp2])
        z = jax.nn.sigmoid(gx_t[:, Hp2:2 * Hp2] + gh[:, Hp2:2 * Hp2])
        n = jnp.tanh(gx_t[:, 2 * Hp2:3 * Hp2]
                     + r * (gh[:, 2 * Hp2:3 * Hp2] + bhn))
        h = (1.0 - z) * n + z * h
        out_ref[t] = h                             # unmasked lane/sublane-dense store

    hid_ref[...] = jnp.tanh(
        jnp.dot(h, fcw_ref[...], preferred_element_type=jnp.float32) + fcb_ref[...])


def _round_up(x, m):
    return ((x + m - 1) // m) * m


def fuse_encoder_params(params):
    """Build the fused, gate-grouped, lane-padded weight set for the kernel."""
    f32 = jnp.float32
    H = params["whh_f"].shape[1]
    E = params["embedding"].shape[1]
    Hdec = params["fc_w"].shape[0]
    Hp = _round_up(H, 64)            # => 2*Hp is a multiple of 128 lanes
    Hdp = _round_up(Hdec, 128)       # lane-dense final store

    def split_gates(w):              # PyTorch layout: [r; z; n] along dim 0
        return w[0:H], w[H:2 * H], w[2 * H:3 * H]

    # Input weights: rows [0:E] see emb(t) (fwd), rows [E:2E] see emb(T-1-t) (bwd).
    # Columns grouped by gate: [r_f r_b | z_f z_b | n_f n_b], each block Hp wide.
    rf, zf, nf = split_gates(params["wih_f"])
    rb, zb, nb = split_gates(params["wih_b"])
    wih = jnp.zeros((2 * E, 6 * Hp), f32)
    wih = wih.at[0:E, 0 * Hp:0 * Hp + H].set(rf.T.astype(f32))
    wih = wih.at[0:E, 2 * Hp:2 * Hp + H].set(zf.T.astype(f32))
    wih = wih.at[0:E, 4 * Hp:4 * Hp + H].set(nf.T.astype(f32))
    wih = wih.at[E:2 * E, 1 * Hp:1 * Hp + H].set(rb.T.astype(f32))
    wih = wih.at[E:2 * E, 3 * Hp:3 * Hp + H].set(zb.T.astype(f32))
    wih = wih.at[E:2 * E, 5 * Hp:5 * Hp + H].set(nb.T.astype(f32))

    # Recurrent weights: block-diagonal over direction, same gate-grouped columns.
    rf, zf, nf = split_gates(params["whh_f"])
    rb, zb, nb = split_gates(params["whh_b"])
    whh = jnp.zeros((2 * Hp, 6 * Hp), f32)
    whh = whh.at[0:H, 0 * Hp:0 * Hp + H].set(rf.T.astype(f32))
    whh = whh.at[0:H, 2 * Hp:2 * Hp + H].set(zf.T.astype(f32))
    whh = whh.at[0:H, 4 * Hp:4 * Hp + H].set(nf.T.astype(f32))
    whh = whh.at[Hp:Hp + H, 1 * Hp:1 * Hp + H].set(rb.T.astype(f32))
    whh = whh.at[Hp:Hp + H, 3 * Hp:3 * Hp + H].set(zb.T.astype(f32))
    whh = whh.at[Hp:Hp + H, 5 * Hp:5 * Hp + H].set(nb.T.astype(f32))

    # b_ih (all gates) + b_hh (r, z) folded into the one-shot input projection.
    brf, bzf, bnf = split_gates(params["bih_f"])
    brb, bzb, bnb = split_gates(params["bih_b"])
    hrf, hzf, hnf = split_gates(params["bhh_f"])
    hrb, hzb, hnb = split_gates(params["bhh_b"])
    gxb = jnp.zeros((1, 6 * Hp), f32)
    gxb = gxb.at[0, 0 * Hp:0 * Hp + H].set((brf + hrf).astype(f32))
    gxb = gxb.at[0, 1 * Hp:1 * Hp + H].set((brb + hrb).astype(f32))
    gxb = gxb.at[0, 2 * Hp:2 * Hp + H].set((bzf + hzf).astype(f32))
    gxb = gxb.at[0, 3 * Hp:3 * Hp + H].set((bzb + hzb).astype(f32))
    gxb = gxb.at[0, 4 * Hp:4 * Hp + H].set(bnf.astype(f32))
    gxb = gxb.at[0, 5 * Hp:5 * Hp + H].set(bnb.astype(f32))

    # b_hn kept separate (inside r*(W_hn h + b_hn)).
    bhn = jnp.zeros((1, 2 * Hp), f32)
    bhn = bhn.at[0, 0:H].set(hnf.astype(f32))
    bhn = bhn.at[0, Hp:Hp + H].set(hnb.astype(f32))

    # fc over cat(h_fwd_last, h_bwd_last): zero rows for padded hidden lanes,
    # zero columns for padded output lanes (store stays full-lane dense).
    fcw = jnp.zeros((2 * Hp, Hdp), f32)
    fcw = fcw.at[0:H, 0:Hdec].set(params["fc_w"].T[0:H].astype(f32))
    fcw = fcw.at[Hp:Hp + H, 0:Hdec].set(params["fc_w"].T[H:2 * H].astype(f32))
    fcb = jnp.zeros((1, Hdp), f32).at[0, 0:Hdec].set(params["fc_b"].astype(f32))

    return dict(wih=wih, whh=whh, gxb=gxb, bhn=bhn, fcw=fcw, fcb=fcb,
                H=H, Hp=Hp, Hdec=Hdec, Hdp=Hdp)


def encoder_forward(x_tokens, params):
    """x_tokens: (T, B) int32.  Returns (out_put (T,B,2H), hidden (B,Hdec))."""
    T, B = x_tokens.shape
    E = params["embedding"].shape[1]
    fused = fuse_encoder_params(params)
    H, Hp, Hdec, Hdp = fused["H"], fused["Hp"], fused["Hdec"], fused["Hdp"]
    Bp = _round_up(max(B, 8), 8)     # sublane-aligned batch (padded rows are discarded)

    # Glue (cheap XLA): embedding gather, eval-mode dropout (identity),
    # batch pad to Bp, time-reversal for the backward direction, reshape.
    embedded = params["embedding"][x_tokens].astype(jnp.float32)         # (T, B, E)
    # TODO(synk): training-mode dropout would be applied to `embedded` here.
    emb_p = jnp.zeros((T, Bp, E), jnp.float32).at[:, :B, :].set(embedded)
    x_pair = jnp.concatenate([emb_p, emb_p[::-1]], axis=-1)              # (T, Bp, 2E)
    x_pair = x_pair.reshape(T * Bp, 2 * E)

    vmem = pl.BlockSpec(memory_space=pltpu.MemorySpace.VMEM)
    args = (x_pair, fused["wih"], fused["whh"], fused["gxb"], fused["bhn"],
            fused["fcw"], fused["fcb"])

    out_pad, hid_pad = pl.pallas_call(
        encoder_kernel,
        out_shape=(jax.ShapeDtypeStruct((T, Bp, 2 * Hp), jnp.float32),
                   jax.ShapeDtypeStruct((Bp, Hdp), jnp.float32)),
        in_specs=[vmem] * len(args),
        out_specs=(vmem, vmem),
        scratch_shapes=[pltpu.VMEM((T * Bp, 6 * Hp), jnp.float32)],      # gx
    )(*args)

    # Wrapper-side (free XLA layout work): drop batch/lane padding, reverse the
    # backward half in time, concatenate directions.
    out_f = out_pad[:, :B, 0:H]                     # fwd hidden at time t
    out_b = out_pad[:, :B, Hp:Hp + H][::-1]         # bwd hidden re-ordered to time t
    out_put = jnp.concatenate([out_f, out_b], axis=-1)                   # (T, B, 2H)
    hidden = hid_pad[:B, :Hdec]                                          # (B, Hdec)
    return out_put, hidden


def encoder_reference(x_tokens, params):
    """Pure-JAX reference with PyTorch-faithful math (HIGHEST precision)."""
    emb = params["embedding"][x_tokens].astype(jnp.float32)              # (T, B, E)
    H = params["whh_f"].shape[1]

    def direction(seq, wih, whh, bih, bhh):
        def step(h, x_t):
            gx = jnp.dot(x_t, wih.T, precision=PREC_REF) + bih
            gh = jnp.dot(h, whh.T, precision=PREC_REF) + bhh
            r = jax.nn.sigmoid(gx[:, :H] + gh[:, :H])
            z = jax.nn.sigmoid(gx[:, H:2 * H] + gh[:, H:2 * H])
            n = jnp.tanh(gx[:, 2 * H:] + r * gh[:, 2 * H:])
            h_new = (1.0 - z) * n + z * h
            return h_new, h_new
        h0 = jnp.zeros((seq.shape[1], H), jnp.float32)
        h_last, outs = lax.scan(step, h0, seq)
        return h_last, outs

    hf, of = direction(emb, params["wih_f"], params["whh_f"], params["bih_f"], params["bhh_f"])
    hb, ob_rev = direction(emb[::-1], params["wih_b"], params["whh_b"], params["bih_b"], params["bhh_b"])
    ob = ob_rev[::-1]
    out = jnp.concatenate([of, ob], axis=-1)
    hidden = jnp.tanh(jnp.dot(jnp.concatenate([hf, hb], axis=-1), params["fc_w"].T,
                              precision=PREC_REF) + params["fc_b"])
    return out, hidden


def init_params(key, input_dim, emb_dim, enc_hid_dim, dec_hid_dim):
    ks = jax.random.split(key, 11)
    s = 0.1
    return {
        "embedding": s * jax.random.normal(ks[0], (input_dim, emb_dim), jnp.float32),
        "wih_f": s * jax.random.normal(ks[1], (3 * enc_hid_dim, emb_dim), jnp.float32),
        "whh_f": s * jax.random.normal(ks[2], (3 * enc_hid_dim, enc_hid_dim), jnp.float32),
        "bih_f": s * jax.random.normal(ks[3], (3 * enc_hid_dim,), jnp.float32),
        "bhh_f": s * jax.random.normal(ks[4], (3 * enc_hid_dim,), jnp.float32),
        "wih_b": s * jax.random.normal(ks[5], (3 * enc_hid_dim, emb_dim), jnp.float32),
        "whh_b": s * jax.random.normal(ks[6], (3 * enc_hid_dim, enc_hid_dim), jnp.float32),
        "bih_b": s * jax.random.normal(ks[7], (3 * enc_hid_dim,), jnp.float32),
        "bhh_b": s * jax.random.normal(ks[8], (3 * enc_hid_dim,), jnp.float32),
        "fc_w": s * jax.random.normal(ks[9], (dec_hid_dim, 2 * enc_hid_dim), jnp.float32),
        "fc_b": s * jax.random.normal(ks[10], (dec_hid_dim,), jnp.float32),
    }


if __name__ == "__main__":
    INPUT_DIM, EMB_DIM, ENC_HID, DEC_HID = 50, 32, 32, 32
    T, B = 8, 2

    key = jax.random.PRNGKey(0)
    k_tok, k_par = jax.random.split(key)
    x = jax.random.randint(k_tok, (T, B), 0, INPUT_DIM, dtype=jnp.int32)
    params = init_params(k_par, INPUT_DIM, EMB_DIM, ENC_HID, DEC_HID)

    out_put, hidden = encoder_forward(x, params)
    jax.block_until_ready((out_put, hidden))

    ref_out, ref_hid = encoder_reference(x, params)
    # Kernel matmuls run default-precision (single bf16 MXU pass, f32 accumulate)
    # on the serial path per the perf review; reference is HIGHEST f32, so the
    # tolerance is relaxed accordingly.
    np.testing.assert_allclose(np.asarray(out_put), np.asarray(ref_out), atol=2e-2, rtol=2e-2)
    np.testing.assert_allclose(np.asarray(hidden), np.asarray(ref_hid), atol=2e-2, rtol=2e-2)

    print("KERNEL_OK")
</pallas_src>

<mosaic_0001>
module attributes {stable_mosaic.version = 11 : i64} {
  func.func @encoder_kernel(%arg0: memref<64x64xf32, #tpu.memory_space<vmem>>, %arg1: memref<64x384xf32, #tpu.memory_space<vmem>>, %arg2: memref<128x384xf32, #tpu.memory_space<vmem>>, %arg3: memref<1x384xf32, #tpu.memory_space<vmem>>, %arg4: memref<1x128xf32, #tpu.memory_space<vmem>>, %arg5: memref<128x128xf32, #tpu.memory_space<vmem>>, %arg6: memref<1x128xf32, #tpu.memory_space<vmem>>, %arg7: memref<8x8x128xf32, #tpu.memory_space<vmem>>, %arg8: memref<8x128xf32, #tpu.memory_space<vmem>>, %arg9: memref<64x384xf32, #tpu.memory_space<vmem>>) attributes {dimension_semantics = [], scalar_prefetch = 0 : i64, scratch_operands = 1 : i64, tpu.core_type = #tpu.core_type<tc>} {
    %c0 = arith.constant 0 : index
    %c0_0 = arith.constant 0 : index
    %0 = vector.load %arg0[%c0, %c0_0] : memref<64x64xf32, #tpu.memory_space<vmem>>, vector<64x64xf32>
    %c0_1 = arith.constant 0 : index
    %c0_2 = arith.constant 0 : index
    %1 = vector.load %arg1[%c0_1, %c0_2] : memref<64x384xf32, #tpu.memory_space<vmem>>, vector<64x384xf32>
    %cst = arith.constant dense<0.000000e+00> : vector<64x384xf32>
    %2 = tpu.matmul %0, %1, %cst {dimension_numbers = #tpu.dot_dimension_numbers<[1], [0], [0], [1], [0, 0, 1, 1], [], []>} : vector<64x64xf32>, vector<64x384xf32>, vector<64x384xf32> -> vector<64x384xf32>
    %c0_3 = arith.constant 0 : index
    %c0_4 = arith.constant 0 : index
    %3 = vector.load %arg3[%c0_3, %c0_4] : memref<1x384xf32, #tpu.memory_space<vmem>>, vector<1x384xf32>
    %4 = vector.broadcast %3 : vector<1x384xf32> to vector<64x384xf32>
    %5 = arith.addf %2, %4 : vector<64x384xf32>
    %c0_5 = arith.constant 0 : index
    %c0_6 = arith.constant 0 : index
    %6 = vector.load %arg9[%c0_5, %c0_6] : memref<64x384xf32, #tpu.memory_space<vmem>>, vector<64x384xf32>
    tpu.vector_store %arg9[%c0_5, %c0_6], %5 {strides = array<i32>} : memref<64x384xf32, #tpu.memory_space<vmem>>, vector<64x384xf32>,
    %c0_7 = arith.constant 0 : index
    %c0_8 = arith.constant 0 : index
    %7 = vector.load %arg4[%c0_7, %c0_8] : memref<1x128xf32, #tpu.memory_space<vmem>>, vector<1x128xf32>
    %8 = vector.shape_cast %7 : vector<1x128xf32> to vector<1x128xf32>
    %9 = vector.broadcast %8 : vector<1x128xf32> to vector<8x128xf32>
    %cst_9 = arith.constant 0.000000e+00 : f32
    %10 = vector.broadcast %cst_9 : f32 to vector<8x128xf32>
    %c0_10 = arith.constant 0 : index
    %c0_11 = arith.constant 0 : index
    %11 = vector.load %arg9[%c0_10, %c0_11] : memref<64x384xf32, #tpu.memory_space<vmem>>, vector<8x384xf32>
    %c0_12 = arith.constant 0 : index
    %c0_13 = arith.constant 0 : index
    %12 = vector.load %arg2[%c0_12, %c0_13] : memref<128x384xf32, #tpu.memory_space<vmem>>, vector<128x384xf32>
    %cst_14 = arith.constant dense<0.000000e+00> : vector<8x384xf32>
    %13 = tpu.matmul %10, %12, %cst_14 {dimension_numbers = #tpu.dot_dimension_numbers<[1], [0], [0], [1], [0, 0, 1, 1], [], []>} : vector<8x128xf32>, vector<128x384xf32>, vector<8x384xf32> -> vector<8x384xf32>
    %14 = vector.extract_strided_slice %11 {offsets = [0, 0], sizes = [8, 128], strides = [1, 1]} : vector<8x384xf32> to vector<8x128xf32>
    %15 = vector.extract_strided_slice %13 {offsets = [0, 0], sizes = [8, 128], strides = [1, 1]} : vector<8x384xf32> to vector<8x128xf32>
    %16 = arith.addf %14, %15 : vector<8x128xf32>
    %17 = arith.negf %16 : vector<8x128xf32>
    %18 = math.exp %17 : vector<8x128xf32>
    %cst_15 = arith.constant 1.000000e+00 : f32
    %19 = vector.broadcast %cst_15 : f32 to vector<8x128xf32>
    %20 = arith.addf %19, %18 : vector<8x128xf32>
    %21 = arith.divf %19, %20 : vector<8x128xf32>
    %22 = vector.extract_strided_slice %11 {offsets = [0, 128], sizes = [8, 128], strides = [1, 1]} : vector<8x384xf32> to vector<8x128xf32>
    %23 = vector.extract_strided_slice %13 {offsets = [0, 128], sizes = [8, 128], strides = [1, 1]} : vector<8x384xf32> to vector<8x128xf32>
    %24 = arith.addf %22, %23 : vector<8x128xf32>
    %25 = arith.negf %24 : vector<8x128xf32>
    %26 = math.exp %25 : vector<8x128xf32>
    %cst_16 = arith.constant 1.000000e+00 : f32
    %27 = vector.broadcast %cst_16 : f32 to vector<8x128xf32>
    %28 = arith.addf %27, %26 : vector<8x128xf32>
    %29 = arith.divf %27, %28 : vector<8x128xf32>
    %30 = vector.extract_strided_slice %11 {offsets = [0, 256], sizes = [8, 128], strides = [1, 1]} : vector<8x384xf32> to vector<8x128xf32>
    %31 = vector.extract_strided_slice %13 {offsets = [0, 256], sizes = [8, 128], strides = [1, 1]} : vector<8x384xf32> to vector<8x128xf32>
    %32 = arith.addf %31, %9 : vector<8x128xf32>
    %33 = arith.mulf %21, %32 : vector<8x128xf32>
    %34 = arith.addf %30, %33 : vector<8x128xf32>
    %35 = math.tanh %34 : vector<8x128xf32>
    %cst_17 = arith.constant 1.000000e+00 : f32
    %36 = vector.broadcast %cst_17 : f32 to vector<8x128xf32>
    %37 = arith.subf %36, %29 : vector<8x128xf32>
    %38 = arith.mulf %37, %35 : vector<8x128xf32>
    %39 = arith.mulf %29, %10 : vector<8x128xf32>
    %40 = arith.addf %38, %39 : vector<8x128xf32>
    %c0_18 = arith.constant 0 : index
    %c0_19 = arith.constant 0 : index
    %c0_20 = arith.constant 0 : index
    %41 = vector.load %arg7[%c0_18, %c0_19, %c0_20] : memref<8x8x128xf32, #tpu.memory_space<vmem>>, vector<1x8x128xf32>
    %42 = vector.shape_cast %41 : vector<1x8x128xf32> to vector<8x128xf32>
    %43 = vector.shape_cast %40 : vector<8x128xf32> to vector<1x8x128xf32>
    tpu.vector_store %arg7[%c0_18, %c0_19, %c0_20], %43 {strides = array<i32>} : memref<8x8x128xf32, #tpu.memory_space<vmem>>, vector<1x8x128xf32>,
    %c8 = arith.constant 8 : index
    %c0_21 = arith.constant 0 : index
    %44 = vector.load %arg9[%c8, %c0_21] : memref<64x384xf32, #tpu.memory_space<vmem>>, vector<8x384xf32>
    %c0_22 = arith.constant 0 : index
    %c0_23 = arith.constant 0 : index
    %45 = vector.load %arg2[%c0_22, %c0_23] : memref<128x384xf32, #tpu.memory_space<vmem>>, vector<128x384xf32>
    %cst_24 = arith.constant dense<0.000000e+00> : vector<8x384xf32>
    %46 = tpu.matmul %40, %45, %cst_24 {dimension_numbers = #tpu.dot_dimension_numbers<[1], [0], [0], [1], [0, 0, 1, 1], [], []>} : vector<8x128xf32>, vector<128x384xf32>, vector<8x384xf32> -> vector<8x384xf32>
    %47 = vector.extract_strided_slice %44 {offsets = [0, 0], sizes = [8, 128], strides = [1, 1]} : vector<8x384xf32> to vector<8x128xf32>
    %48 = vector.extract_strided_slice %46 {offsets = [0, 0], sizes = [8, 128], strides = [1, 1]} : vector<8x384xf32> to vector<8x128xf32>
    %49 = arith.addf %47, %48 : vector<8x128xf32>
    %50 = arith.negf %49 : vector<8x128xf32>
    %51 = math.exp %50 : vector<8x128xf32>
    %cst_25 = arith.constant 1.000000e+00 : f32
    %52 = vector.broadcast %cst_25 : f32 to vector<8x128xf32>
    %53 = arith.addf %52, %51 : vector<8x128xf32>
    %54 = arith.divf %52, %53 : vector<8x128xf32>
    %55 = vector.extract_strided_slice %44 {offsets = [0, 128], sizes = [8, 128], strides = [1, 1]} : vector<8x384xf32> to vector<8x128xf32>
    %56 = vector.extract_strided_slice %46 {offsets = [0, 128], sizes = [8, 128], strides = [1, 1]} : vector<8x384xf32> to vector<8x128xf32>
    %57 = arith.addf %55, %56 : vector<8x128xf32>
    %58 = arith.negf %57 : vector<8x128xf32>
    %59 = math.exp %58 : vector<8x128xf32>
    %cst_26 = arith.constant 1.000000e+00 : f32
    %60 = vector.broadcast %cst_26 : f32 to vector<8x128xf32>
    %61 = arith.addf %60, %59 : vector<8x128xf32>
    %62 = arith.divf %60, %61 : vector<8x128xf32>
    %63 = vector.extract_strided_slice %44 {offsets = [0, 256], sizes = [8, 128], strides = [1, 1]} : vector<8x384xf32> to vector<8x128xf32>
    %64 = vector.extract_strided_slice %46 {offsets = [0, 256], sizes = [8, 128], strides = [1, 1]} : vector<8x384xf32> to vector<8x128xf32>
    %65 = arith.addf %64, %9 : vector<8x128xf32>
    %66 = arith.mulf %54, %65 : vector<8x128xf32>
    %67 = arith.addf %63, %66 : vector<8x128xf32>
    %68 = math.tanh %67 : vector<8x128xf32>
    %cst_27 = arith.constant 1.000000e+00 : f32
    %69 = vector.broadcast %cst_27 : f32 to vector<8x128xf32>
    %70 = arith.subf %69, %62 : vector<8x128xf32>
    %71 = arith.mulf %70, %68 : vector<8x128xf32>
    %72 = arith.mulf %62, %40 : vector<8x128xf32>
    %73 = arith.addf %71, %72 : vector<8x128xf32>
    %c1 = arith.constant 1 : index
    %c0_28 = arith.constant 0 : index
    %c0_29 = arith.constant 0 : index
    %74 = vector.load %arg7[%c1, %c0_28, %c0_29] : memref<8x8x128xf32, #tpu.memory_space<vmem>>, vector<1x8x128xf32>
    %75 = vector.shape_cast %74 : vector<1x8x128xf32> to vector<8x128xf32>
    %76 = vector.shape_cast %73 : vector<8x128xf32> to vector<1x8x128xf32>
    tpu.vector_store %arg7[%c1, %c0_28, %c0_29], %76 {strides = array<i32>} : memref<8x8x128xf32, #tpu.memory_space<vmem>>, vector<1x8x128xf32>,
    %c16 = arith.constant 16 : index
    %c0_30 = arith.constant 0 : index
    %77 = vector.load %arg9[%c16, %c0_30] : memref<64x384xf32, #tpu.memory_space<vmem>>, vector<8x384xf32>
    %c0_31 = arith.constant 0 : index
    %c0_32 = arith.constant 0 : index
    %78 = vector.load %arg2[%c0_31, %c0_32] : memref<128x384xf32, #tpu.memory_space<vmem>>, vector<128x384xf32>
    %cst_33 = arith.constant dense<0.000000e+00> : vector<8x384xf32>
    %79 = tpu.matmul %73, %78, %cst_33 {dimension_numbers = #tpu.dot_dimension_numbers<[1], [0], [0], [1], [0, 0, 1, 1], [], []>} : vector<8x128xf32>, vector<128x384xf32>, vector<8x384xf32> -> vector<8x384xf32>
    %80 = vector.extract_strided_slice %77 {offsets = [0, 0], sizes = [8, 128], strides = [1, 1]} : vector<8x384xf32> to vector<8x128xf32>
    %81 = vector.extract_strided_slice %79 {offsets = [0, 0], sizes = [8, 128], strides = [1, 1]} : vector<8x384xf32> to vector<8x128xf32>
    %82 = arith.addf %80, %81 : vector<8x128xf32>
    %83 = arith.negf %82 : vector<8x128xf32>
    %84 = math.exp %83 : vector<8x128xf32>
    %cst_34 = arith.constant 1.000000e+00 : f32
    %85 = vector.broadcast %cst_34 : f32 to vector<8x128xf32>
    %86 = arith.addf %85, %84 : vector<8x128xf32>
    %87 = arith.divf %85, %86 : vector<8x128xf32>
    %88 = vector.extract_strided_slice %77 {offsets = [0, 128], sizes = [8, 128], strides = [1, 1]} : vector<8x384xf32> to vector<8x128xf32>
    %89 = vector.extract_strided_slice %79 {offsets = [0, 128], sizes = [8, 128], strides = [1, 1]} : vector<8x384xf32> to vector<8x128xf32>
    %90 = arith.addf %88, %89 : vector<8x128xf32>
    %91 = arith.negf %90 : vector<8x128xf32>
    %92 = math.exp %91 : vector<8x128xf32>
    %cst_35 = arith.constant 1.000000e+00 : f32
    %93 = vector.broadcast %cst_35 : f32 to vector<8x128xf32>
    %94 = arith.addf %93, %92 : vector<8x128xf32>
    %95 = arith.divf %93, %94 : vector<8x128xf32>
    %96 = vector.extract_strided_slice %77 {offsets = [0, 256], sizes = [8, 128], strides = [1, 1]} : vector<8x384xf32> to vector<8x128xf32>
    %97 = vector.extract_strided_slice %79 {offsets = [0, 256], sizes = [8, 128], strides = [1, 1]} : vector<8x384xf32> to vector<8x128xf32>
    %98 = arith.addf %97, %9 : vector<8x128xf32>
    %99 = arith.mulf %87, %98 : vector<8x128xf32>
    %100 = arith.addf %96, %99 : vector<8x128xf32>
    %101 = math.tanh %100 : vector<8x128xf32>
    %cst_36 = arith.constant 1.000000e+00 : f32
    %102 = vector.broadcast %cst_36 : f32 to vector<8x128xf32>
    %103 = arith.subf %102, %95 : vector<8x128xf32>
    %104 = arith.mulf %103, %101 : vector<8x128xf32>
    %105 = arith.mulf %95, %73 : vector<8x128xf32>
    %106 = arith.addf %104, %105 : vector<8x128xf32>
    %c2 = arith.constant 2 : index
    %c0_37 = arith.constant 0 : index
    %c0_38 = arith.constant 0 : index
    %107 = vector.load %arg7[%c2, %c0_37, %c0_38] : memref<8x8x128xf32, #tpu.memory_space<vmem>>, vector<1x8x128xf32>
    %108 = vector.shape_cast %107 : vector<1x8x128xf32> to vector<8x128xf32>
    %109 = vector.shape_cast %106 : vector<8x128xf32> to vector<1x8x128xf32>
    tpu.vector_store %arg7[%c2, %c0_37, %c0_38], %109 {strides = array<i32>} : memref<8x8x128xf32, #tpu.memory_space<vmem>>, vector<1x8x128xf32>,
    %c24 = arith.constant 24 : index
    %c0_39 = arith.constant 0 : index
    %110 = vector.load %arg9[%c24, %c0_39] : memref<64x384xf32, #tpu.memory_space<vmem>>, vector<8x384xf32>
    %c0_40 = arith.constant 0 : index
    %c0_41 = arith.constant 0 : index
    %111 = vector.load %arg2[%c0_40, %c0_41] : memref<128x384xf32, #tpu.memory_space<vmem>>, vector<128x384xf32>
    %cst_42 = arith.constant dense<0.000000e+00> : vector<8x384xf32>
    %112 = tpu.matmul %106, %111, %cst_42 {dimension_numbers = #tpu.dot_dimension_numbers<[1], [0], [0], [1], [0, 0, 1, 1], [], []>} : vector<8x128xf32>, vector<128x384xf32>, vector<8x384xf32> -> vector<8x384xf32>
    %113 = vector.extract_strided_slice %110 {offsets = [0, 0], sizes = [8, 128], strides = [1, 1]} : vector<8x384xf32> to vector<8x128xf32>
    %114 = vector.extract_strided_slice %112 {offsets = [0, 0], sizes = [8, 128], strides = [1, 1]} : vector<8x384xf32> to vector<8x128xf32>
    %115 = arith.addf %113, %114 : vector<8x128xf32>
    %116 = arith.negf %115 : vector<8x128xf32>
    %117 = math.exp %116 : vector<8x128xf32>
    %cst_43 = arith.constant 1.000000e+00 : f32
    %118 = vector.broadcast %cst_43 : f32 to vector<8x128xf32>
    %119 = arith.addf %118, %117 : vector<8x128xf32>
    %120 = arith.divf %118, %119 : vector<8x128xf32>
    %121 = vector.extract_strided_slice %110 {offsets = [0, 128], sizes = [8, 128], strides = [1, 1]} : vector<8x384xf32> to vector<8x128xf32>
    %122 = vector.extract_strided_slice %112 {offsets = [0, 128], sizes = [8, 128], strides = [1, 1]} : vector<8x384xf32> to vector<8x128xf32>
    %123 = arith.addf %121, %122 : vector<8x128xf32>
    %124 = arith.negf %123 : vector<8x128xf32>
    %125 = math.exp %124 : vector<8x128xf32>
    %cst_44 = arith.constant 1.000000e+00 : f32
    %126 = vector.broadcast %cst_44 : f32 to vector<8x128xf32>
    %127 = arith.addf %126, %125 : vector<8x128xf32>
    %128 = arith.divf %126, %127 : vector<8x128xf32>
    %129 = vector.extract_strided_slice %110 {offsets = [0, 256], sizes = [8, 128], strides = [1, 1]} : vector<8x384xf32> to vector<8x128xf32>
    %130 = vector.extract_strided_slice %112 {offsets = [0, 256], sizes = [8, 128], strides = [1, 1]} : vector<8x384xf32> to vector<8x128xf32>
    %131 = arith.addf %130, %9 : vector<8x128xf32>
    %132 = arith.mulf %120, %131 : vector<8x128xf32>
    %133 = arith.addf %129, %132 : vector<8x128xf32>
    %134 = math.tanh %133 : vector<8x128xf32>
    %cst_45 = arith.constant 1.000000e+00 : f32
    %135 = vector.broadcast %cst_45 : f32 to vector<8x128xf32>
    %136 = arith.subf %135, %128 : vector<8x128xf32>
    %137 = arith.mulf %136, %134 : vector<8x128xf32>
    %138 = arith.mulf %128, %106 : vector<8x128xf32>
    %139 = arith.addf %137, %138 : vector<8x128xf32>
    %c3 = arith.constant 3 : index
    %c0_46 = arith.constant 0 : index
    %c0_47 = arith.constant 0 : index
    %140 = vector.load %arg7[%c3, %c0_46, %c0_47] : memref<8x8x128xf32, #tpu.memory_space<vmem>>, vector<1x8x128xf32>
    %141 = vector.shape_cast %140 : vector<1x8x128xf32> to vector<8x128xf32>
    %142 = vector.shape_cast %139 : vector<8x128xf32> to vector<1x8x128xf32>
    tpu.vector_store %arg7[%c3, %c0_46, %c0_47], %142 {strides = array<i32>} : memref<8x8x128xf32, #tpu.memory_space<vmem>>, vector<1x8x128xf32>,
    %c32 = arith.constant 32 : index
    %c0_48 = arith.constant 0 : index
    %143 = vector.load %arg9[%c32, %c0_48] : memref<64x384xf32, #tpu.memory_space<vmem>>, vector<8x384xf32>
    %c0_49 = arith.constant 0 : index
    %c0_50 = arith.constant 0 : index
    %144 = vector.load %arg2[%c0_49, %c0_50] : memref<128x384xf32, #tpu.memory_space<vmem>>, vector<128x384xf32>
    %cst_51 = arith.constant dense<0.000000e+00> : vector<8x384xf32>
    %145 = tpu.matmul %139, %144, %cst_51 {dimension_numbers = #tpu.dot_dimension_numbers<[1], [0], [0], [1], [0, 0, 1, 1], [], []>} : vector<8x128xf32>, vector<128x384xf32>, vector<8x384xf32> -> vector<8x384xf32>
    %146 = vector.extract_strided_slice %143 {offsets = [0, 0], sizes = [8, 128], strides = [1, 1]} : vector<8x384xf32> to vector<8x128xf32>
    %147 = vector.extract_strided_slice %145 {offsets = [0, 0], sizes = [8, 128], strides = [1, 1]} : vector<8x384xf32> to vector<8x128xf32>
    %148 = arith.addf %146, %147 : vector<8x128xf32>
    %149 = arith.negf %148 : vector<8x128xf32>
    %150 = math.exp %149 : vector<8x128xf32>
    %cst_52 = arith.constant 1.000000e+00 : f32
    %151 = vector.broadcast %cst_52 : f32 to vector<8x128xf32>
    %152 = arith.addf %151, %150 : vector<8x128xf32>
    %153 = arith.divf %151, %152 : vector<8x128xf32>
    %154 = vector.extract_strided_slice %143 {offsets = [0, 128], sizes = [8, 128], strides = [1, 1]} : vector<8x384xf32> to vector<8x128xf32>
    %155 = vector.extract_strided_slice %145 {offsets = [0, 128], sizes = [8, 128], strides = [1, 1]} : vector<8x384xf32> to vector<8x128xf32>
    %156 = arith.addf %154, %155 : vector<8x128xf32>
    %157 = arith.negf %156 : vector<8x128xf32>
    %158 = math.exp %157 : vector<8x128xf32>
    %cst_53 = arith.constant 1.000000e+00 : f32
    %159 = vector.broadcast %cst_53 : f32 to vector<8x128xf32>
    %160 = arith.addf %159, %158 : vector<8x128xf32>
    %161 = arith.divf %159, %160 : vector<8x128xf32>
    %162 = vector.extract_strided_slice %143 {offsets = [0, 256], sizes = [8, 128], strides = [1, 1]} : vector<8x384xf32> to vector<8x128xf32>
    %163 = vector.extract_strided_slice %145 {offsets = [0, 256], sizes = [8, 128], strides = [1, 1]} : vector<8x384xf32> to vector<8x128xf32>
    %164 = arith.addf %163, %9 : vector<8x128xf32>
    %165 = arith.mulf %153, %164 : vector<8x128xf32>
    %166 = arith.addf %162, %165 : vector<8x128xf32>
    %167 = math.tanh %166 : vector<8x128xf32>
    %cst_54 = arith.constant 1.000000e+00 : f32
    %168 = vector.broadcast %cst_54 : f32 to vector<8x128xf32>
    %169 = arith.subf %168, %161 : vector<8x128xf32>
    %170 = arith.mulf %169, %167 : vector<8x128xf32>
    %171 = arith.mulf %161, %139 : vector<8x128xf32>
    %172 = arith.addf %170, %171 : vector<8x128xf32>
    %c4 = arith.constant 4 : index
    %c0_55 = arith.constant 0 : index
    %c0_56 = arith.constant 0 : index
    %173 = vector.load %arg7[%c4, %c0_55, %c0_56] : memref<8x8x128xf32, #tpu.memory_space<vmem>>, vector<1x8x128xf32>
    %174 = vector.shape_cast %173 : vector<1x8x128xf32> to vector<8x128xf32>
    %175 = vector.shape_cast %172 : vector<8x128xf32> to vector<1x8x128xf32>
    tpu.vector_store %arg7[%c4, %c0_55, %c0_56], %175 {strides = array<i32>} : memref<8x8x128xf32, #tpu.memory_space<vmem>>, vector<1x8x128xf32>,
    %c40 = arith.constant 40 : index
    %c0_57 = arith.constant 0 : index
    %176 = vector.load %arg9[%c40, %c0_57] : memref<64x384xf32, #tpu.memory_space<vmem>>, vector<8x384xf32>
    %c0_58 = arith.constant 0 : index
    %c0_59 = arith.constant 0 : index
    %177 = vector.load %arg2[%c0_58, %c0_59] : memref<128x384xf32, #tpu.memory_space<vmem>>, vector<128x384xf32>
    %cst_60 = arith.constant dense<0.000000e+00> : vector<8x384xf32>
    %178 = tpu.matmul %172, %177, %cst_60 {dimension_numbers = #tpu.dot_dimension_numbers<[1], [0], [0], [1], [0, 0, 1, 1], [], []>} : vector<8x128xf32>, vector<128x384xf32>, vector<8x384xf32> -> vector<8x384xf32>
    %179 = vector.extract_strided_slice %176 {offsets = [0, 0], sizes = [8, 128], strides = [1, 1]} : vector<8x384xf32> to vector<8x128xf32>
    %180 = vector.extract_strided_slice %178 {offsets = [0, 0], sizes = [8, 128], strides = [1, 1]} : vector<8x384xf32> to vector<8x128xf32>
    %181 = arith.addf %179, %180 : vector<8x128xf32>
    %182 = arith.negf %181 : vector<8x128xf32>
    %183 = math.exp %182 : vector<8x128xf32>
    %cst_61 = arith.constant 1.000000e+00 : f32
    %184 = vector.broadcast %cst_61 : f32 to vector<8x128xf32>
    %185 = arith.addf %184, %183 : vector<8x128xf32>
    %186 = arith.divf %184, %185 : vector<8x128xf32>
    %187 = vector.extract_strided_slice %176 {offsets = [0, 128], sizes = [8, 128], strides = [1, 1]} : vector<8x384xf32> to vector<8x128xf32>
    %188 = vector.extract_strided_slice %178 {offsets = [0, 128], sizes = [8, 128], strides = [1, 1]} : vector<8x384xf32> to vector<8x128xf32>
    %189 = arith.addf %187, %188 : vector<8x128xf32>
    %190 = arith.negf %189 : vector<8x128xf32>
    %191 = math.exp %190 : vector<8x128xf32>
    %cst_62 = arith.constant 1.000000e+00 : f32
    %192 = vector.broadcast %cst_62 : f32 to vector<8x128xf32>
    %193 = arith.addf %192, %191 : vector<8x128xf32>
    %194 = arith.divf %192, %193 : vector<8x128xf32>
    %195 = vector.extract_strided_slice %176 {offsets = [0, 256], sizes = [8, 128], strides = [1, 1]} : vector<8x384xf32> to vector<8x128xf32>
    %196 = vector.extract_strided_slice %178 {offsets = [0, 256], sizes = [8, 128], strides = [1, 1]} : vector<8x384xf32> to vector<8x128xf32>
    %197 = arith.addf %196, %9 : vector<8x128xf32>
    %198 = arith.mulf %186, %197 : vector<8x128xf32>
    %199 = arith.addf %195, %198 : vector<8x128xf32>
    %200 = math.tanh %199 : vector<8x128xf32>
    %cst_63 = arith.constant 1.000000e+00 : f32
    %201 = vector.broadcast %cst_63 : f32 to vector<8x128xf32>
    %202 = arith.subf %201, %194 : vector<8x128xf32>
    %203 = arith.mulf %202, %200 : vector<8x128xf32>
    %204 = arith.mulf %194, %172 : vector<8x128xf32>
    %205 = arith.addf %203, %204 : vector<8x128xf32>
    %c5 = arith.constant 5 : index
    %c0_64 = arith.constant 0 : index
    %c0_65 = arith.constant 0 : index
    %206 = vector.load %arg7[%c5, %c0_64, %c0_65] : memref<8x8x128xf32, #tpu.memory_space<vmem>>, vector<1x8x128xf32>
    %207 = vector.shape_cast %206 : vector<1x8x128xf32> to vector<8x128xf32>
    %208 = vector.shape_cast %205 : vector<8x128xf32> to vector<1x8x128xf32>
    tpu.vector_store %arg7[%c5, %c0_64, %c0_65], %208 {strides = array<i32>} : memref<8x8x128xf32, #tpu.memory_space<vmem>>, vector<1x8x128xf32>,
    %c48 = arith.constant 48 : index
    %c0_66 = arith.constant 0 : index
    %209 = vector.load %arg9[%c48, %c0_66] : memref<64x384xf32, #tpu.memory_space<vmem>>, vector<8x384xf32>
    %c0_67 = arith.constant 0 : index
    %c0_68 = arith.constant 0 : index
    %210 = vector.load %arg2[%c0_67, %c0_68] : memref<128x384xf32, #tpu.memory_space<vmem>>, vector<128x384xf32>
    %cst_69 = arith.constant dense<0.000000e+00> : vector<8x384xf32>
    %211 = tpu.matmul %205, %210, %cst_69 {dimension_numbers = #tpu.dot_dimension_numbers<[1], [0], [0], [1], [0, 0, 1, 1], [], []>} : vector<8x128xf32>, vector<128x384xf32>, vector<8x384xf32> -> vector<8x384xf32>
    %212 = vector.extract_strided_slice %209 {offsets = [0, 0], sizes = [8, 128], strides = [1, 1]} : vector<8x384xf32> to vector<8x128xf32>
    %213 = vector.extract_strided_slice %211 {offsets = [0, 0], sizes = [8, 128], strides = [1, 1]} : vector<8x384xf32> to vector<8x128xf32>
    %214 = arith.addf %212, %213 : vector<8x128xf32>
    %215 = arith.negf %214 : vector<8x128xf32>
    %216 = math.exp %215 : vector<8x128xf32>
    %cst_70 = arith.constant 1.000000e+00 : f32
    %217 = vector.broadcast %cst_70 : f32 to vector<8x128xf32>
    %218 = arith.addf %217, %216 : vector<8x128xf32>
    %219 = arith.divf %217, %218 : vector<8x128xf32>
    %220 = vector.extract_strided_slice %209 {offsets = [0, 128], sizes = [8, 128], strides = [1, 1]} : vector<8x384xf32> to vector<8x128xf32>
    %221 = vector.extract_strided_slice %211 {offsets = [0, 128], sizes = [8, 128], strides = [1, 1]} : vector<8x384xf32> to vector<8x128xf32>
    %222 = arith.addf %220, %221 : vector<8x128xf32>
    %223 = arith.negf %222 : vector<8x128xf32>
    %224 = math.exp %223 : vector<8x128xf32>
    %cst_71 = arith.constant 1.000000e+00 : f32
    %225 = vector.broadcast %cst_71 : f32 to vector<8x128xf32>
    %226 = arith.addf %225, %224 : vector<8x128xf32>
    %227 = arith.divf %225, %226 : vector<8x128xf32>
    %228 = vector.extract_strided_slice %209 {offsets = [0, 256], sizes = [8, 128], strides = [1, 1]} : vector<8x384xf32> to vector<8x128xf32>
    %229 = vector.extract_strided_slice %211 {offsets = [0, 256], sizes = [8, 128], strides = [1, 1]} : vector<8x384xf32> to vector<8x128xf32>
    %230 = arith.addf %229, %9 : vector<8x128xf32>
    %231 = arith.mulf %219, %230 : vector<8x128xf32>
    %232 = arith.addf %228, %231 : vector<8x128xf32>
    %233 = math.tanh %232 : vector<8x128xf32>
    %cst_72 = arith.constant 1.000000e+00 : f32
    %234 = vector.broadcast %cst_72 : f32 to vector<8x128xf32>
    %235 = arith.subf %234, %227 : vector<8x128xf32>
    %236 = arith.mulf %235, %233 : vector<8x128xf32>
    %237 = arith.mulf %227, %205 : vector<8x128xf32>
    %238 = arith.addf %236, %237 : vector<8x128xf32>
    %c6 = arith.constant 6 : index
    %c0_73 = arith.constant 0 : index
    %c0_74 = arith.constant 0 : index
    %239 = vector.load %arg7[%c6, %c0_73, %c0_74] : memref<8x8x128xf32, #tpu.memory_space<vmem>>, vector<1x8x128xf32>
    %240 = vector.shape_cast %239 : vector<1x8x128xf32> to vector<8x128xf32>
    %241 = vector.shape_cast %238 : vector<8x128xf32> to vector<1x8x128xf32>
    tpu.vector_store %arg7[%c6, %c0_73, %c0_74], %241 {strides = array<i32>} : memref<8x8x128xf32, #tpu.memory_space<vmem>>, vector<1x8x128xf32>,
    %c56 = arith.constant 56 : index
    %c0_75 = arith.constant 0 : index
    %242 = vector.load %arg9[%c56, %c0_75] : memref<64x384xf32, #tpu.memory_space<vmem>>, vector<8x384xf32>
    %c0_76 = arith.constant 0 : index
    %c0_77 = arith.constant 0 : index
    %243 = vector.load %arg2[%c0_76, %c0_77] : memref<128x384xf32, #tpu.memory_space<vmem>>, vector<128x384xf32>
    %cst_78 = arith.constant dense<0.000000e+00> : vector<8x384xf32>
    %244 = tpu.matmul %238, %243, %cst_78 {dimension_numbers = #tpu.dot_dimension_numbers<[1], [0], [0], [1], [0, 0, 1, 1], [], []>} : vector<8x128xf32>, vector<128x384xf32>, vector<8x384xf32> -> vector<8x384xf32>
    %245 = vector.extract_strided_slice %242 {offsets = [0, 0], sizes = [8, 128], strides = [1, 1]} : vector<8x384xf32> to vector<8x128xf32>
    %246 = vector.extract_strided_slice %244 {offsets = [0, 0], sizes = [8, 128], strides = [1, 1]} : vector<8x384xf32> to vector<8x128xf32>
    %247 = arith.addf %245, %246 : vector<8x128xf32>
    %248 = arith.negf %247 : vector<8x128xf32>
    %249 = math.exp %248 : vector<8x128xf32>
    %cst_79 = arith.constant 1.000000e+00 : f32
    %250 = vector.broadcast %cst_79 : f32 to vector<8x128xf32>
    %251 = arith.addf %250, %249 : vector<8x128xf32>
    %252 = arith.divf %250, %251 : vector<8x128xf32>
    %253 = vector.extract_strided_slice %242 {offsets = [0, 128], sizes = [8, 128], strides = [1, 1]} : vector<8x384xf32> to vector<8x128xf32>
    %254 = vector.extract_strided_slice %244 {offsets = [0, 128], sizes = [8, 128], strides = [1, 1]} : vector<8x384xf32> to vector<8x128xf32>
    %255 = arith.addf %253, %254 : vector<8x128xf32>
    %256 = arith.negf %255 : vector<8x128xf32>
    %257 = math.exp %256 : vector<8x128xf32>
    %cst_80 = arith.constant 1.000000e+00 : f32
    %258 = vector.broadcast %cst_80 : f32 to vector<8x128xf32>
    %259 = arith.addf %258, %257 : vector<8x128xf32>
    %260 = arith.divf %258, %259 : vector<8x128xf32>
    %261 = vector.extract_strided_slice %242 {offsets = [0, 256], sizes = [8, 128], strides = [1, 1]} : vector<8x384xf32> to vector<8x128xf32>
    %262 = vector.extract_strided_slice %244 {offsets = [0, 256], sizes = [8, 128], strides = [1, 1]} : vector<8x384xf32> to vector<8x128xf32>
    %263 = arith.addf %262, %9 : vector<8x128xf32>
    %264 = arith.mulf %252, %263 : vector<8x128xf32>
    %265 = arith.addf %261, %264 : vector<8x128xf32>
    %266 = math.tanh %265 : vector<8x128xf32>
    %cst_81 = arith.constant 1.000000e+00 : f32
    %267 = vector.broadcast %cst_81 : f32 to vector<8x128xf32>
    %268 = arith.subf %267, %260 : vector<8x128xf32>
    %269 = arith.mulf %268, %266 : vector<8x128xf32>
    %270 = arith.mulf %260, %238 : vector<8x128xf32>
    %271 = arith.addf %269, %270 : vector<8x128xf32>
    %c7 = arith.constant 7 : index
    %c0_82 = arith.constant 0 : index
    %c0_83 = arith.constant 0 : index
    %272 = vector.load %arg7[%c7, %c0_82, %c0_83] : memref<8x8x128xf32, #tpu.memory_space<vmem>>, vector<1x8x128xf32>
    %273 = vector.shape_cast %272 : vector<1x8x128xf32> to vector<8x128xf32>
    %274 = vector.shape_cast %271 : vector<8x128xf32> to vector<1x8x128xf32>
    tpu.vector_store %arg7[%c7, %c0_82, %c0_83], %274 {strides = array<i32>} : memref<8x8x128xf32, #tpu.memory_space<vmem>>, vector<1x8x128xf32>,
    %c0_84 = arith.constant 0 : index
    %c0_85 = arith.constant 0 : index
    %275 = vector.load %arg5[%c0_84, %c0_85] : memref<128x128xf32, #tpu.memory_space<vmem>>, vector<128x128xf32>
    %cst_86 = arith.constant dense<0.000000e+00> : vector<8x128xf32>
    %276 = tpu.matmul %271, %275, %cst_86 {dimension_numbers = #tpu.dot_dimension_numbers<[1], [0], [0], [1], [0, 0, 1, 1], [], []>} : vector<8x128xf32>, vector<128x128xf32>, vector<8x128xf32> -> vector<8x128xf32>
    %c0_87 = arith.constant 0 : index
    %c0_88 = arith.constant 0 : index
    %277 = vector.load %arg6[%c0_87, %c0_88] : memref<1x128xf32, #tpu.memory_space<vmem>>, vector<1x128xf32>
    %278 = vector.broadcast %277 : vector<1x128xf32> to vector<8x128xf32>
    %279 = arith.addf %276, %278 : vector<8x128xf32>
    %280 = math.tanh %279 : vector<8x128xf32>
    %c0_89 = arith.constant 0 : index
    %c0_90 = arith.constant 0 : index
    %281 = vector.load %arg8[%c0_89, %c0_90] : memref<8x128xf32, #tpu.memory_space<vmem>>, vector<8x128xf32>
    tpu.vector_store %arg8[%c0_89, %c0_90], %280 {strides = array<i32>} : memref<8x128xf32, #tpu.memory_space<vmem>>, vector<8x128xf32>,
    return
  }
}

</mosaic_0001>

<bundles_post_ra>
// kernel: tpu_custom_call.1
= control target key start
LH: loop header
LB: loop body
LE: loop exit
PB: predicated region body
PF: predicated region fallthrough
CT: control target
= control target key end

     0   :  { %14 = vsyncpa [#allocation4], 0  ;;  %s4239_s0 = inlined_call_operand.hbm [shape: f32[64,64], index: 0, kind: input, shape index: {}]   ;;  %s4240_s1 = inlined_call_operand.hbm [shape: f32[64,384], index: 1, kind: input, shape index: {}]   ;;  %s4241_s2 = inlined_call_operand.hbm [shape: f32[128,384], index: 2, kind: input, shape index: {}]   ;;  %s4242_s3 = inlined_call_operand.vmem [shape: f32[1,384], index: 3, kind: input, shape index: {}]   ;;  %s4243_s4 = inlined_call_operand.vmem [shape: f32[1,128], index: 4, kind: input, shape index: {}]   ;;  %s4244_s5 = inlined_call_operand.hbm [shape: f32[128,128], index: 5, kind: input, shape index: {}]   ;;  %s4245_s6 = inlined_call_operand.vmem [shape: f32[1,128], index: 6, kind: input, shape index: {}]   ;;  %s4246_s7 = inlined_call_operand.hbm [shape: f32[8,8,128], index: 7, kind: output, shape index: {0}]   ;;  %s4247_s8 = inlined_call_operand.hbm [shape: f32[8,128], index: 8, kind: output, shape index: {1}]  }
   0x1   :  { %15 = vsyncpa [#allocation7], 0 }
   0x2   :  { %16 = vsyncpa [#allocation10], 0 }
   0x3   :  { %17 = vsyncpa [#allocation5], 0 }
   0x4   :  { %18 = vsyncpa [#allocation13], 0  ;;  %s3583_s27 = smov [#allocation6]   ;;  %s3441_s9 = scalar_lea.hbm %s4240_s1, 3072 }
   0x5   :  { %s36_s28 = sshll.u32 %s3583_s27, 4  ;;  %p3442_p0 = scmp.ne.s32.totalorder %s4240_s1, %s3441_s9  ;;  %s37_s28 = int_to_ptr.vmem [resolvable:$true] %s36_s28 }
   0x6   :  { %p3445_p1 = scmp.lt.u32.totalorder %s3441_s9, %s4240_s1 }
   0x8   :  { %p3447_p2 = pnand %p3445_p1, %p3442_p0 }
   0xa   :  { %3450 = shalt.err (!%p3447_p2)
}
   0xb   :  { %s3451_s14 = scalar_lea.vmem %s37_s28, 3072  ;;  %p3456_p4 = scmp.lt.s32.totalorder %s37_s28, %s37_s28 }
   0xc   :  { %p3452_p3 = scmp.ne.s32.totalorder %s37_s28, %s3451_s14  ;;  %p3457_p5 = scmp.lt.s32.totalorder %s3451_s14, %s3451_s14 }
   0xe   :  { %p3458_p6 = por %p3457_p5, %p3456_p4 }
  0x10   :  { %p3459_p7 = pnand %p3458_p6, %p3452_p3 }
  0x12   :  { %3462 = shalt.err (!%p3459_p7)
}
  0x13   :  { %s3584_s15 = smov 384   ;;  %s3585_s16 = smov 24  }
  0x14   :  { %42 = dma.hbm_to_vmem [thread:$0]  %s4240_s1, 3072, %s37_s28, [#allocation7], %s3584_s15, %s3584_s15, %s3585_s16  }
  0x15   :  { %s3586_s19 = smov [#allocation3]   ;;  %s3463_s23 = scalar_lea.hbm %s4239_s0, 1024 }
  0x16   :  { %s24_s20 = sshll.u32 %s3586_s19, 4  ;;  %p3464_p8 = scmp.ne.s32.totalorder %s4239_s0, %s3463_s23  ;;  %s25_s20 = int_to_ptr.vmem [resolvable:$true] %s24_s20 }
  0x17   :  { %p3467_p9 = scmp.lt.u32.totalorder %s3463_s23, %s4239_s0 }
  0x19   :  { %p3469_p10 = pnand %p3467_p9, %p3464_p8 }
  0x1b   :  { %3472 = shalt.err (!%p3469_p10)
}
  0x1c   :  { %s3473_s29 = scalar_lea.vmem %s25_s20, 1024  ;;  %p3478_p12 = scmp.lt.s32.totalorder %s25_s20, %s25_s20 }
  0x1d   :  { %p3474_p11 = scmp.ne.s32.totalorder %s25_s20, %s3473_s29  ;;  %p3479_p13 = scmp.lt.s32.totalorder %s3473_s29, %s3473_s29 }
  0x1f   :  { %p3480_p0 = por %p3479_p13, %p3478_p12 }
  0x21   :  { %p3481_p1 = pnand %p3480_p0, %p3474_p11 }
  0x23   :  { %3484 = shalt.err (!%p3481_p1)
}
  0x24   :  { %s3587_s1 = smov 128   ;;  %s3588_s28 = smov 8  }
  0x25   :  { %30 = dma.hbm_to_vmem [thread:$0]  %s4239_s0, 1024, %s25_s20, [#allocation4], %s3587_s1, %s3587_s1, %s3588_s28  }
  0x26   :  { %s3589_s10 = smov [#allocation8]   ;;  %s3590_s12 = smov [#allocation9]  }
  0x27   :  { %s48_s11 = sshll.u32 %s3589_s10, 4  ;;  %s64_s13 = sshll.u32 %s3590_s12, 4  ;;  %s49_s11 = int_to_ptr.vmem [resolvable:$true] %s48_s11  ;;  %s3671_s13 = int_to_ptr.vmem [resolvable:$true] %s64_s13 }
  0x28   :  { %s3485_s18 = scalar_lea.hbm %s4241_s2, 6144 }
  0x29   :  { %p3486_p2 = scmp.ne.s32.totalorder %s4241_s2, %s3485_s18  ;;  %p3489_p3 = scmp.lt.u32.totalorder %s3485_s18, %s4241_s2 }
  0x2b   :  { %p3491_p4 = pnand %p3489_p3, %p3486_p2 }
  0x2d   :  { %3494 = shalt.err (!%p3491_p4)
}
  0x2e   :  { %s3495_s0 = scalar_lea.vmem %s49_s11, 6144  ;;  %p3500_p6 = scmp.lt.s32.totalorder %s49_s11, %s49_s11 }
  0x2f   :  { %p3496_p5 = scmp.ne.s32.totalorder %s49_s11, %s3495_s0  ;;  %p3501_p7 = scmp.lt.s32.totalorder %s3495_s0, %s3495_s0 }
  0x31   :  { %p3502_p8 = por %p3501_p7, %p3500_p6 }
  0x33   :  { %p3503_p9 = pnand %p3502_p8, %p3496_p5 }
  0x35   :  { %3506 = shalt.err (!%p3503_p9)
}
  0x36   :  { %54 = dma.hbm_to_vmem [thread:$0]  %s4241_s2, 6144, %s49_s11, [#allocation7], %s3584_s15, %s3584_s15, %s3585_s16  }
  0x37   :  { %s3507_s27 = scalar_lea.hbm %s4244_s5, 2048 }
  0x38   :  { %p3508_p10 = scmp.ne.s32.totalorder %s4244_s5, %s3507_s27  ;;  %p3511_p11 = scmp.lt.u32.totalorder %s3507_s27, %s4244_s5 }
  0x3a   :  { %p3513_p12 = pnand %p3511_p11, %p3508_p10 }
  0x3c   :  { %3516 = shalt.err (!%p3513_p12)
}
  0x3d   :  { %s3517_s12 = scalar_lea.vmem %s3671_s13, 2048  ;;  %p3522_p0 = scmp.lt.s32.totalorder %s3671_s13, %s3671_s13 }
  0x3e   :  { %p3518_p13 = scmp.ne.s32.totalorder %s3671_s13, %s3517_s12  ;;  %p3523_p1 = scmp.lt.s32.totalorder %s3517_s12, %s3517_s12 }
  0x40   :  { %p3524_p2 = por %p3523_p1, %p3522_p0 }
  0x42   :  { %p3525_p3 = pnand %p3524_p2, %p3518_p13 }
  0x44   :  { %3528 = shalt.err (!%p3525_p3)
}
  0x45   :  { %70 = dma.hbm_to_vmem [thread:$0]  %s4244_s5, 2048, %s3671_s13, [#allocation10], %s3587_s1, %s3587_s1, %s3588_s28  }
  0x46   :  { %3573 = dma.done.wait [#allocation4], 1024  }
  0x47   :  { %3574 = vsyncadd [#allocation4], 4294966272 }
  0x48   :  { %3575 = dma.done.wait [#allocation7], 9216  }
  0x49   :  { %3576 = vsyncadd [#allocation7], 4294958080 }
  0x4a   :  { %3577 = dma.done.wait [#allocation10], 2048  }
  0x4b   :  { %3578 = vsyncadd [#allocation10], 4294965248  ;;  %v3591_v0 = vmov 0.0   ;;  %v94_v1 = vld [vmem:[#allocation6 + $0x8] sm:$0xff]  ;;  %v97_v2 = vld [vmem:[#allocation6 + $0x20] sm:$0xff]  ;;  %vm134_vm0 = vcmask 523264  }
  0x4c   :  { %223 = vmatprep.mubr.f32.mxu0 %v3591_v0  ;;  %v93_v3 = vld [vmem:[#allocation6] sm:$0xff]  ;;  %v2809_v4 = vpack.c.bf16 %v97_v2, %v94_v1  ;;  %v96_v5 = vld [vmem:[#allocation6 + $0x18] sm:$0xff]  ;;  %v103_v7 = vld [vmem:[#allocation6 + $0x50] sm:$0xff]  ;;  %vm3593_vm1 = vmmov 0   ;;  %s3594_s17 = smov [#allocation11]  }
  0x4d   :  { %v100_v6 = vld [vmem:[#allocation6 + $0x38] sm:$0xff]  ;;  %v2811_v8 = vpack.c.bf16 %v96_v5, %v93_v3  ;;  %v99_v10 = vld [vmem:[#allocation6 + $0x30] sm:$0xff]  ;;  %v102_v11 = vld [vmem:[#allocation6 + $0x48] sm:$0xff]  ;;  %v3592_v5 = vmov 0.0|0.0   ;;  %s2235_s18 = sshll.u32 %s3594_s17, 4  ;;  %s2236_s18 = int_to_ptr.vmem [resolvable:$true] %s2235_s18 }
  0x4e   :  { %v2813_v9 = vpack.c.bf16 %v103_v7, %v100_v6  ;;  %v106_v12 = vld [vmem:[#allocation6 + $0x68] sm:$0xff]  ;;  %2810 = vmatprep.subr.bf16.mxu0 %v2809_v4  ;;  %v109_v13 = vld [vmem:[#allocation6 + $0x80] sm:$0xff]  ;;  %v2815_v14 = vpack.c.bf16 %v102_v11, %v99_v10  ;;  %v108_v17 = vld [vmem:[#allocation6 + $0x78] sm:$0xff]  ;;  %p3534_p5 = scmp.lt.s32.totalorder %s2236_s18, %s2236_s18 }
  0x4f   :  { %2812 = vmatpush1.bf16.msra.mxu0 %v2811_v8  ;;  %v2817_v15 = vpack.c.bf16 %v109_v13, %v106_v12  ;;  %v105_v16 = vld [vmem:[#allocation6 + $0x60] sm:$0xff]  ;;  %v112_v19 = vld [vmem:[#allocation6 + $0x98] sm:$0xff]  ;;  %v115_v20 = vld [vmem:[#allocation6 + $0xb0] sm:$0xff] }
  0x50   :  { %2814 = vmatprep.subr.bf16.mxu0 %v2813_v9  ;;  %v85_v18 = vld [vmem:[#allocation3] sm:$0xff]  ;;  %v2819_v21 = vpack.c.bf16 %v108_v17, %v105_v16  ;;  %v2821_v22 = vpack.c.bf16 %v115_v20, %v112_v19  ;;  %v111_v23 = vld [vmem:[#allocation6 + $0x90] sm:$0xff]  ;;  %v114_v24 = vld [vmem:[#allocation6 + $0xa8] sm:$0xff] }
  0x51   :  { %2482 = vmatprep.mubr.msk.f32.mxu1 %vm134_vm0, %v85_v18  ;;  %v412_v25 = vld [vmem:[#allocation8 + $0x8] sm:$0xff]  ;;  %v415_v26 = vld [vmem:[#allocation8 + $0x20] sm:$0xff]  ;;  %v95_v27 = vld [vmem:[#allocation6 + $0x10] sm:$0xff]  ;;  %v2823_v30 = vpack.c.bf16 %v114_v24, %v111_v23 }
  0x52   :  { %v98_v28 = vld [vmem:[#allocation6 + $0x28] sm:$0xff]  ;;  %v101_v31 = vld [vmem:[#allocation6 + $0x40] sm:$0xff]  ;;  %v3710_v32 = vpack.c.bf16 %v415_v26, %v412_v25  ;;  %v414_v34 = vld [vmem:[#allocation8 + $0x18] sm:$0xff] }
  0x53   :  { %2816 = vmatpush1.bf16.msra.mxu0 %v2815_v14  ;;  %v2825_v29 = vpack.c.bf16 %v98_v28, %v95_v27  ;;  %v411_v33 = vld [vmem:[#allocation8] sm:$0xff]  ;;  %v104_v35 = vld [vmem:[#allocation6 + $0x58] sm:$0xff]  ;;  %v421_v37 = vld [vmem:[#allocation8 + $0x50] sm:$0xff] }
  0x54   :  { %2818 = vmatprep.subr.bf16.mxu0 %v2817_v15  ;;  %v418_v36 = vld [vmem:[#allocation8 + $0x38] sm:$0xff]  ;;  %v2829_v38 = vpack.c.bf16 %v104_v35, %v101_v31  ;;  %v107_v39 = vld [vmem:[#allocation6 + $0x70] sm:$0xff]  ;;  %v110_v40 = vld [vmem:[#allocation6 + $0x88] sm:$0xff]  ;;  %v3712_v41 = vpack.c.bf16 %v414_v34, %v411_v33 }
  0x55   :  { %2826 = vmatprep.subr.bf16.mxu1 %v2825_v29  ;;  %v417_v42 = vld [vmem:[#allocation8 + $0x30] sm:$0xff]  ;;  %v2833_v43 = vpack.c.bf16 %v110_v40, %v107_v39  ;;  %v3715_v44 = vpack.c.bf16 %v421_v37, %v418_v36  ;;  %v420_v45 = vld [vmem:[#allocation8 + $0x48] sm:$0xff]  ;;  %v113_v46 = vld [vmem:[#allocation6 + $0xa0] sm:$0xff] }
  0x56   :  { %2828 = vmatpush3.bf16.msra.mxu1 %v2825_v29  ;;  %v116_v47 = vld [vmem:[#allocation6 + $0xb8] sm:$0xff]  ;;  %v424_v48 = vld [vmem:[#allocation8 + $0x68] sm:$0xff]  ;;  %v427_v49 = vld [vmem:[#allocation8 + $0x80] sm:$0xff]  ;;  %v3720_v52 = vpack.c.bf16 %v420_v45, %v417_v42 }
  0x57   :  { %2820 = vmatpush1.bf16.msra.mxu0 %v2819_v21  ;;  %2830 = vmatprep.subr.bf16.mxu1 %v2829_v38  ;;  %v2837_v50 = vpack.c.bf16 %v116_v47, %v113_v46  ;;  %v86_v51 = vld [vmem:[#allocation3 + $0x8] sm:$0xff]  ;;  %v3723_v53 = vpack.c.bf16 %v427_v49, %v424_v48  ;;  %v423_v54 = vld [vmem:[#allocation8 + $0x60] sm:$0xff]  ;;  %v426_v55 = vld [vmem:[#allocation8 + $0x78] sm:$0xff] }
  0x58   :  { %2822 = vmatprep.subr.bf16.mxu0 %v2821_v22  ;;  %v430_v56 = vld [vmem:[#allocation8 + $0x98] sm:$0xff]  ;;  %v433_v57 = vld [vmem:[#allocation8 + $0xb0] sm:$0xff]  ;;  %v416_v59 = vld [vmem:[#allocation8 + $0x28] sm:$0xff]  ;;  %v3728_v61 = vpack.c.bf16 %v426_v55, %v423_v54 }
  0x59   :  { %v413_v58 = vld [vmem:[#allocation8 + $0x10] sm:$0xff]  ;;  %v3731_v62 = vpack.c.bf16 %v433_v57, %v430_v56  ;;  %v432_v1 = vld [vmem:[#allocation8 + $0xa8] sm:$0xff]  ;;  %v439_v3 = vld [vmem:[#allocation8 + $0xe0] sm:$0xff] }
  0x5a   :  { %2832 = vmatpush3.bf16.msra.mxu1 %v2829_v38  ;;  %v87_v60 = vld [vmem:[#allocation3 + $0x10] sm:$0xff]  ;;  %v436_v2 = vld [vmem:[#allocation8 + $0xc8] sm:$0xff]  ;;  %v3733_v4 = vpack.c.bf16 %v416_v59, %v413_v58  ;;  %v419_v6 = vld [vmem:[#allocation8 + $0x40] sm:$0xff] }
  0x5b   :  { %2824 = vmatpush1.bf16.msra.mxu0 %v2823_v30  ;;  %2834 = vmatprep.subr.bf16.mxu1 %v2833_v43  ;;  %v429_v63 = vld [vmem:[#allocation8 + $0x90] sm:$0xff]  ;;  %v422_v7 = vld [vmem:[#allocation8 + $0x58] sm:$0xff]  ;;  %v3742_v10 = vpack.c.bf16 %v439_v3, %v436_v2  ;;  %v435_v11 = vld [vmem:[#allocation8 + $0xc0] sm:$0xff] }
  0x5c   :  { %2842 = vmatprep.subr.bf16.mxu0 %v3710_v32  ;;  %v88_v8 = vld [vmem:[#allocation3 + $0x18] sm:$0xff]  ;;  %v3739_v9 = vpack.c.bf16 %v432_v1, %v429_v63  ;;  %v445_v14 = vld [vmem:[#allocation8 + $0x110] sm:$0xff]  ;;  %v3746_v15 = vpack.c.bf16 %v422_v7, %v419_v6  ;;  %v428_v17 = vld [vmem:[#allocation8 + $0x88] sm:$0xff] }
  0x5d   :  { %v438_v12 = vld [vmem:[#allocation8 + $0xd8] sm:$0xff]  ;;  %v425_v16 = vld [vmem:[#allocation8 + $0x70] sm:$0xff]  ;;  %v444_v22 = vld [vmem:[#allocation8 + $0x108] sm:$0xff] }
  0x5e   :  { %2263 = vmatmul.mubr.msk.f32.vlgmr.msra.gmra.mrb[0].mxu0 %vm134_vm0, %v85_v18  ;;  %2836 = vmatpush3.bf16.msra.mxu1 %v2833_v43  ;;  %v442_v13 = vld [vmem:[#allocation8 + $0xf8] sm:$0xff]  ;;  %v89_v18 = vld [vmem:[#allocation3 + $0x20] sm:$0xff]  ;;  %v3753_v19 = vpack.c.bf16 %v438_v12, %v435_v11  ;;  %v441_v21 = vld [vmem:[#allocation8 + $0xf0] sm:$0xff]  ;;  %v3760_v25 = vpack.c.bf16 %v428_v17, %v425_v16 }
  0x5f   :  { %2844 = vmatpush1.bf16.msra.mxu0 %v3712_v41  ;;  %229 = vmatprep.mubr.f32.mxu0 %v3591_v0  ;;  %v3756_v20 = vpack.c.bf16 %v445_v14, %v442_v13  ;;  %v448_v23 = vld [vmem:[#allocation8 + $0x128] sm:$0xff]  ;;  %v451_v24 = vld [vmem:[#allocation8 + $0x140] sm:$0xff]  ;;  %v434_v27 = vld [vmem:[#allocation8 + $0xb8] sm:$0xff]  ;;  %v3767_v29 = vpack.c.bf16 %v444_v22, %v441_v21 }
  0x60   :  { %2846 = vmatprep.subr.bf16.mxu0 %v3715_v44  ;;  %2838 = vmatprep.subr.bf16.mxu1 %v2837_v50  ;;  %v431_v26 = vld [vmem:[#allocation8 + $0xa0] sm:$0xff]  ;;  %v90_v28 = vld [vmem:[#allocation3 + $0x28] sm:$0xff]  ;;  %v91_v30 = vld [vmem:[#allocation3 + $0x30] sm:$0xff]  ;;  %v3770_v31 = vpack.c.bf16 %v451_v24, %v448_v23 }
  0x61   :  { %v447_v33 = vld [vmem:[#allocation8 + $0x120] sm:$0xff]  ;;  %v450_v34 = vld [vmem:[#allocation8 + $0x138] sm:$0xff]  ;;  %v457_v36 = vld [vmem:[#allocation8 + $0x170] sm:$0xff]  ;;  %v3774_v37 = vpack.c.bf16 %v434_v27, %v431_v26 }
  0x62   :  { %2264 = vmatmul.mubr.msk.f32.gmra.mrb[2].mxu0 %vm134_vm0, %v86_v51  ;;  %2840 = vmatpush3.bf16.msra.mxu1 %v2837_v50  ;;  %v454_v35 = vld [vmem:[#allocation8 + $0x158] sm:$0xff]  ;;  %v437_v38 = vld [vmem:[#allocation8 + $0xd0] sm:$0xff]  ;;  %v440_v39 = vld [vmem:[#allocation8 + $0xe8] sm:$0xff]  ;;  %v3781_v40 = vpack.c.bf16 %v450_v34, %v447_v33 }
  0x63   :  { %2848 = vmatpush1.bf16.msra.mxu0 %v3720_v52  ;;  %235 = vmatprep.mubr.f32.mxu0 %v3591_v0  ;;  %v92_v42 = vld [vmem:[#allocation3 + $0x38] sm:$0xff]  ;;  %v3784_v43 = vpack.c.bf16 %v457_v36, %v454_v35  ;;  %v453_v45 = vld [vmem:[#allocation8 + $0x150] sm:$0xff]  ;;  %v456_v46 = vld [vmem:[#allocation8 + $0x168] sm:$0xff]  ;;  %v3788_v47 = vpack.c.bf16 %v440_v39, %v437_v38 }
  0x64   :  { %2850 = vmatprep.subr.bf16.mxu0 %v3723_v53  ;;  %2873 = vmatprep.subr.bf16.mxu1 %v3592_v5  ;;  %v443_v48 = vld [vmem:[#allocation8 + $0x100] sm:$0xff]  ;;  %v446_v49 = vld [vmem:[#allocation8 + $0x118] sm:$0xff]  ;;  %v3796_v50 = vpack.c.bf16 %v456_v46, %v453_v45  ;;  %v449_v54 = vld [vmem:[#allocation8 + $0x130] sm:$0xff] }
  0x65   :  { %2483 = vmatmul.mubr.msk.f32.vlgmr.msra.gmra.mrb[0].mxu1 %vm134_vm0, %v86_v51  ;;  %v3800_v51 = vpack.c.bf16 %v446_v49, %v443_v48  ;;  %v452_v55 = vld [vmem:[#allocation8 + $0x148] sm:$0xff]  ;;  %v455_v57 = vld [vmem:[#allocation8 + $0x160] sm:$0xff]  ;;  %v458_v58 = vld [vmem:[#allocation8 + $0x178] sm:$0xff] }
  0x66   :  { %2265 = vmatmul.mubr.msk.f32.gmra.mrb[4].mxu0 %vm134_vm0, %v87_v60  ;;  %2875 = vmatpush3.bf16.msra.mxu1 %v3733_v4  ;;  %v3808_v56 = vpack.c.bf16 %v452_v55, %v449_v54  ;;  %v3816_v59 = vpack.c.bf16 %v458_v58, %v455_v57  ;;  %v117_v2 = vld [vmem:[%s4242_s3] sm:$0x7] }
  0x67   :  { %2852 = vmatpush1.bf16.msra.mxu0 %v3728_v61  ;;  %241 = vmatprep.mubr.f32.mxu0 %v3591_v0  ;;  %v3880_v55 = vld [vmem:[%s4243_s4] ss:$0 sm:$0xff] }
  0x68   :  { %2854 = vmatprep.subr.bf16.mxu0 %v3731_v62  ;;  %2485 = vmatprep.mubr.msk.f32.mxu1 %vm134_vm0, %v87_v60  ;;  %v119_v60 = vlaneseq }
  0x69   :  { %2876 = vmatprep.subr.bf16.mxu1 %v3592_v5  ;;  %2486 = vmatmul.mubr.msk.f32.gmra.mrb[2].mxu1 %vm134_vm0, %v88_v8 }
  0x6a   :  { %2266 = vmatmul.mubr.msk.f32.gmra.mrb[6].mxu0 %vm134_vm0, %v88_v8  ;;  %2878 = vmatpush3.bf16.msra.mxu1 %v3746_v15  ;;  %v120_v63 = vshrl.u32 %v119_v60, 7 }
  0x6b   :  { %2856 = vmatpush1.bf16.msra.mxu0 %v3739_v9  ;;  %247 = vmatprep.mubr.f32.mxu0 %v3591_v0 }
  0x6c   :  { %2858 = vmatprep.subr.bf16.mxu0 %v3742_v10  ;;  %2488 = vmatprep.mubr.msk.f32.mxu1 %vm134_vm0, %v89_v18  ;;  %v129_v1 = vsub.s32 2, %v120_v63  ;;  %v121_v27 = vsub.s32 0, %v120_v63 }
  0x6d   :  { %2879 = vmatprep.subr.bf16.mxu1 %v3592_v5  ;;  %2489 = vmatmul.mubr.msk.f32.gmra.mrb[4].mxu1 %vm134_vm0, %v90_v28 }
  0x6e   :  { %2267 = vmatmul.mubr.msk.f32.gmra.mrb[8].mxu0 %vm134_vm0, %v89_v18  ;;  %2881 = vmatpush3.bf16.msra.mxu1 %v3760_v25  ;;  %v130_v3 = vrot.slane %v117_v2, %v129_v1 }
  0x6f   :  { %2860 = vmatpush1.bf16.msra.mxu0 %v3753_v19  ;;  %253 = vmatprep.mubr.f32.mxu0 %v3591_v0 }
  0x70   :  { %2862 = vmatprep.subr.bf16.mxu0 %v3756_v20  ;;  %2491 = vmatprep.mubr.msk.f32.mxu1 %vm134_vm0, %v91_v30 }
  0x71   :  { %2882 = vmatprep.subr.bf16.mxu1 %v3592_v5  ;;  %2492 = vmatmul.mubr.msk.f32.gmra.mrb[6].mxu1 %vm134_vm0, %v92_v42 }
  0x72   :  { %2268 = vmatmul.mubr.msk.f32.gmra.mrb[10].mxu0 %vm134_vm0, %v90_v28  ;;  %2884 = vmatpush3.bf16.msra.mxu1 %v3774_v37  ;;  %v125_v28 = vsub.s32 1, %v120_v63 }
  0x73   :  { %2864 = vmatpush1.bf16.msra.mxu0 %v3767_v29  ;;  %259 = vmatprep.mubr.f32.mxu0 %v3591_v0 }
  0x74   :  { %2866 = vmatprep.subr.bf16.mxu0 %v3770_v31  ;;  %2526 = vmatprep.mubr.msk.f32.mxu1 %vm3593_vm1, %v3591_v0  ;;  %v3873_v34 = vrot.slane %v117_v2, %v125_v28 }
  0x75   :  { %2885 = vmatprep.subr.bf16.mxu1 %v3592_v5 }
  0x76   :  { %2269 = vmatmul.mubr.msk.f32.gmra.mrb[12].mxu0 %vm134_vm0, %v91_v30  ;;  %2887 = vmatpush3.bf16.msra.mxu1 %v3788_v47  ;;  %v3871_v30 = vrot.slane %v117_v2, %v121_v27 }
  0x77   :  { %2868 = vmatpush1.bf16.msra.mxu0 %v3781_v40  ;;  %265 = vmatprep.mubr.f32.mxu0 %v3591_v0 }
  0x78   :  { %2870 = vmatprep.subr.bf16.mxu0 %v3784_v43  ;;  %2888 = vmatprep.subr.bf16.mxu1 %v3592_v5 }
  0x7a   :  { %2270 = vmatmul.mubr.msk.f32.gmra.mrb[14].mxu0 %vm134_vm0, %v92_v42  ;;  %2890 = vmatpush3.bf16.msra.mxu1 %v3800_v51 }
  0x7b   :  { %2872 = vmatpush1.bf16.msra.mxu0 %v3796_v50  ;;  %523 = vmatprep.mubr.f32.mxu0 %v3591_v0 }
  0x7c   :  { %2898 = vmatprep.subr.bf16.mxu0 %v3710_v32  ;;  %2891 = vmatprep.subr.bf16.mxu1 %v3592_v5 }
  0x7e   :  { %524 = vmatmul.mubr.f32.vlgmr.msra.gmra.mrb[0].mxu0 %v3591_v0  ;;  %2893 = vmatpush3.bf16.msra.mxu1 %v3808_v56 }
  0x7f   :  { %2900 = vmatpush1.bf16.msra.mxu0 %v3712_v41  ;;  %738 = vmatprep.mubr.f32.mxu0 %v3591_v0 }
  0x80   :  { %2902 = vmatprep.subr.bf16.mxu0 %v3715_v44  ;;  %2894 = vmatprep.subr.bf16.mxu1 %v3592_v5 }
  0x82   :  { %2896 = vmatpush3.bf16.msra.mxu1 %v3816_v59 }
  0x83   :  { %2904 = vmatpush1.bf16.msra.mxu0 %v3720_v52  ;;  %2929 = vmatprep.subr.bf16.mxu1 %v3592_v5 }
  0x84   :  { %2906 = vmatprep.subr.bf16.mxu0 %v3723_v53 }
  0x85   :  { %2527 = vmatmul.mubr.f32.vlgmr.msra.gmra.mrb[8].mxu1 %v3591_v0 }
  0x86   :  { %2931 = vmatpush3.bf16.msra.mxu1 %v3733_v4  ;;  %2561 = vmatprep.mubr.msk.f32.mxu1 %vm3593_vm1, %v3591_v0 }
  0x87   :  { %2908 = vmatpush1.bf16.msra.mxu0 %v3728_v61  ;;  %2932 = vmatprep.subr.bf16.mxu1 %v3592_v5 }
  0x88   :  { %2910 = vmatprep.subr.bf16.mxu0 %v3731_v62 }
  0x8a   :  { %2934 = vmatpush3.bf16.msra.mxu1 %v3746_v15 }
  0x8b   :  { %2912 = vmatpush1.bf16.msra.mxu0 %v3739_v9  ;;  %2935 = vmatprep.subr.bf16.mxu1 %v3592_v5 }
  0x8c   :  { %2914 = vmatprep.subr.bf16.mxu0 %v3742_v10 }
  0x8e   :  { %2937 = vmatpush3.bf16.msra.mxu1 %v3760_v25 }
  0x8f   :  { %2916 = vmatpush1.bf16.msra.mxu0 %v3753_v19  ;;  %2938 = vmatprep.subr.bf16.mxu1 %v3592_v5 }
  0x90   :  { %2918 = vmatprep.subr.bf16.mxu0 %v3756_v20 }
  0x92   :  { %2940 = vmatpush3.bf16.msra.mxu1 %v3774_v37 }
  0x93   :  { %2920 = vmatpush1.bf16.msra.mxu0 %v3767_v29  ;;  %2941 = vmatprep.subr.bf16.mxu1 %v3592_v5 }
  0x94   :  { %2922 = vmatprep.subr.bf16.mxu0 %v3770_v31 }
  0x96   :  { %2943 = vmatpush3.bf16.msra.mxu1 %v3788_v47 }
  0x97   :  { %2924 = vmatpush1.bf16.msra.mxu0 %v3781_v40  ;;  %2944 = vmatprep.subr.bf16.mxu1 %v3592_v5 }
  0x98   :  { %2926 = vmatprep.subr.bf16.mxu0 %v3784_v43 }
  0x9a   :  { %2946 = vmatpush3.bf16.msra.mxu1 %v3800_v51 }
  0x9b   :  { %2928 = vmatpush1.bf16.msra.mxu0 %v3796_v50  ;;  %2947 = vmatprep.subr.bf16.mxu1 %v3592_v5 }
  0x9c   :  { %2954 = vmatprep.subr.bf16.mxu0 %v3710_v32 }
  0x9e   :  { %2949 = vmatpush3.bf16.msra.mxu1 %v3808_v56 }
  0x9f   :  { %2950 = vmatprep.subr.bf16.mxu1 %v3592_v5 }
  0xa2   :  { %2952 = vmatpush3.bf16.msra.mxu1 %v3816_v59 }
  0xa3   :  { %2985 = vmatprep.subr.bf16.mxu1 %v3592_v5 }
 0x138   :  { %v2484_v6 = vpop.f32.mrb[0].mxu1 }
 0x139   :  { %v3857_v7 = vadd.f32 %v2484_v6, %v130_v3  ;;  %v338_v8 = vpop.f32.mrb[1].mxu1 }
 0x13a   :  { %v339_v63 = vadd.f32 %v338_v8, %v130_v3 }
 0x13c   :  { %v2487_v11 = vpop.f32.mrb[2].mxu1 }
 0x13d   :  { %v3859_v12 = vadd.f32 %v2487_v11, %v130_v3  ;;  %v348_v13 = vpop.f32.mrb[3].mxu1 }
 0x13e   :  { %v3861_v14 = vadd.f32 %v348_v13, %v130_v3 }
 0x140   :  { %v2490_v16 = vpop.f32.mrb[4].mxu1 }
 0x141   :  { %v3863_v17 = vadd.f32 %v2490_v16, %v130_v3  ;;  %v358_v18 = vpop.f32.mrb[5].mxu1 }
 0x142   :  { %v3865_v21 = vadd.f32 %v358_v18, %v130_v3 }
 0x144   :  { %v2493_v22 = vpop.f32.mrb[6].mxu1 }
 0x145   :  { %v3867_v23 = vadd.f32 %v2493_v22, %v130_v3  ;;  %v368_v24 = vpop.f32.mrb[7].mxu1 }
 0x146   :  { %v3869_v26 = vadd.f32 %v368_v24, %v130_v3 }
 0x151   :  { %v525_v33 = vpop.f32.mrb[0].mxu0 }
 0x152   :  { %v3313_v35 = vadd.f32 %v525_v33, %v3871_v30  ;;  %v527_v36 = vpop.f32.mrb[1].mxu0 }
 0x153   :  { %v3314_v39 = vadd.f32 %v527_v36, %v3873_v34 }
 0x154   :  { %v2280_v38 = vmul.f32 -1.442695, %v3313_v35 }
 0x155   :  { %v2281_v42 = vmul.f32 -1.442695, %v3314_v39 }
 0x156   :  { %3358 = vpow2.f32 %v2280_v38 }
 0x157   :  { %3360 = vpow2.f32 %v2281_v42 }
 0x158   :  { %v596_v45 = vpop.f32.mrb[8].mxu1 }
 0x159   :  { %v2528_v46 = vpop.f32.mrb[9].mxu1  ;;  %v614_v58 = vadd.f32 %v3880_v55, %v596_v45 }
 0x160   :  { %v3359_v48 = vpop.eup %3358 }
 0x161   :  { %v604_v49 = vadd.f32 1.0, %v3359_v48  ;;  %v3361_v54 = vpop.eup %3360 }
 0x162   :  { %v611_v57 = vadd.f32 1.0, %v3361_v54 }
 0x163   :  { %3362 = vrcp.f32 %v604_v49 }
 0x164   :  { %3364 = vrcp.f32 %v611_v57 }
 0x16d   :  { %v3363_v60 = vpop.eup %3362 }
 0x16e   :  { %v615_v1 = vmul.f32 %v3363_v60, %v614_v58  ;;  %v3365_v6 = vpop.eup %3364 }
 0x16f   :  { %v618_v11 = vsub.f32 1.0, %v3365_v6  ;;  %v620_v18 = vmul.f32 0.0, %v3365_v6  ;;  %v1278_v6 = vld [vmem:[#allocation8 + $0x20] sm:$0xff] }
 0x170   :  { %v616_v2 = vadd.f32 %v615_v1, %v339_v63 }
 0x172   :  { %3366 = vtanh.f32 %v616_v2 }
 0x17c   :  { %v3367_v13 = vpop.eup %3366 }
 0x17d   :  { %v619_v16 = vmul.f32 %v3367_v13, %v618_v11  ;;  %v1277_v13 = vld [vmem:[#allocation8 + $0x18] sm:$0xff] }
 0x17f   :  { %v3883_v22 = vadd.f32 %v620_v18, %v619_v16  ;;  %v1281_v18 = vld [vmem:[#allocation8 + $0x38] sm:$0xff] }
 0x181   :  { %622 = vst [vmem:[#allocation11] sm:$0xff] %v3883_v22  ;;  %739 = vmatmul.mubr.f32.vlgmr.msra.gmra.mrb[2].mxu0 %v3883_v22  ;;  %2562 = vmatmul.mubr.f32.vlgmr.msra.gmra.mrb[10].mxu1 %v3883_v22 }
 0x182   :  { %2956 = vmatpush1.bf16.msra.mxu0 %v3712_v41  ;;  %2987 = vmatpush3.bf16.msra.mxu1 %v3733_v4 }
 0x183   :  { %2958 = vmatprep.subr.bf16.mxu0 %v3715_v44  ;;  %2988 = vmatprep.subr.bf16.mxu1 %v3592_v5 }
 0x184   :  { %954 = vmatprep.mubr.f32.mxu0 %v3591_v0  ;;  %2596 = vmatprep.mubr.msk.f32.mxu1 %vm3593_vm1, %v3591_v0 }
 0x186   :  { %2960 = vmatpush1.bf16.msra.mxu0 %v3720_v52  ;;  %2990 = vmatpush3.bf16.msra.mxu1 %v3746_v15 }
 0x187   :  { %2962 = vmatprep.subr.bf16.mxu0 %v3723_v53  ;;  %2991 = vmatprep.subr.bf16.mxu1 %v3592_v5 }
 0x18a   :  { %2964 = vmatpush1.bf16.msra.mxu0 %v3728_v61  ;;  %2993 = vmatpush3.bf16.msra.mxu1 %v3760_v25 }
 0x18b   :  { %2966 = vmatprep.subr.bf16.mxu0 %v3731_v62  ;;  %2994 = vmatprep.subr.bf16.mxu1 %v3592_v5 }
 0x18e   :  { %2968 = vmatpush1.bf16.msra.mxu0 %v3739_v9  ;;  %2996 = vmatpush3.bf16.msra.mxu1 %v3774_v37 }
 0x18f   :  { %2970 = vmatprep.subr.bf16.mxu0 %v3742_v10  ;;  %2997 = vmatprep.subr.bf16.mxu1 %v3592_v5 }
 0x192   :  { %2972 = vmatpush1.bf16.msra.mxu0 %v3753_v19  ;;  %2999 = vmatpush3.bf16.msra.mxu1 %v3788_v47 }
 0x193   :  { %2974 = vmatprep.subr.bf16.mxu0 %v3756_v20  ;;  %3000 = vmatprep.subr.bf16.mxu1 %v3592_v5 }
 0x196   :  { %2976 = vmatpush1.bf16.msra.mxu0 %v3767_v29  ;;  %3002 = vmatpush3.bf16.msra.mxu1 %v3800_v51 }
 0x197   :  { %2978 = vmatprep.subr.bf16.mxu0 %v3770_v31  ;;  %3003 = vmatprep.subr.bf16.mxu1 %v3592_v5 }
 0x19a   :  { %2980 = vmatpush1.bf16.msra.mxu0 %v3781_v40  ;;  %3005 = vmatpush3.bf16.msra.mxu1 %v3808_v56 }
 0x19b   :  { %2982 = vmatprep.subr.bf16.mxu0 %v3784_v43  ;;  %3006 = vmatprep.subr.bf16.mxu1 %v3592_v5 }
 0x19e   :  { %2984 = vmatpush1.bf16.msra.mxu0 %v3796_v50  ;;  %3008 = vmatpush3.bf16.msra.mxu1 %v3816_v59 }
 0x19f   :  { %3010 = vmatprep.subr.bf16.mxu0 %v3710_v32  ;;  %3041 = vmatprep.subr.bf16.mxu1 %v3592_v5 }
 0x254   :  { %v740_v3 = vpop.f32.mrb[2].mxu0  ;;  %v811_v8 = vpop.f32.mrb[10].mxu1 }
 0x255   :  { %v3315_v24 = vadd.f32 %v740_v3, %v3871_v30  ;;  %v742_v27 = vpop.f32.mrb[3].mxu0  ;;  %v2563_v28 = vpop.f32.mrb[11].mxu1  ;;  %v829_v32 = vadd.f32 %v3880_v55, %v811_v8  ;;  %v1280_v3 = vld [vmem:[#allocation8 + $0x30] sm:$0xff] }
 0x256   :  { %v3316_v35 = vadd.f32 %v742_v27, %v3873_v34  ;;  %v1290_v27 = vld [vmem:[#allocation8 + $0x80] sm:$0xff] }
 0x257   :  { %v2282_v33 = vmul.f32 -1.442695, %v3315_v24  ;;  %v1287_v24 = vld [vmem:[#allocation8 + $0x68] sm:$0xff] }
 0x258   :  { %v2283_v36 = vmul.f32 -1.442695, %v3316_v35  ;;  %v3992_v28 = vpack.c.bf16 %v1290_v27, %v1287_v24  ;;  %v1289_v35 = vld [vmem:[#allocation8 + $0x78] sm:$0xff] }
 0x259   :  { %3368 = vpow2.f32 %v2282_v33  ;;  %v1286_v33 = vld [vmem:[#allocation8 + $0x60] sm:$0xff] }
 0x25a   :  { %3370 = vpow2.f32 %v2283_v36  ;;  %v3994_v36 = vpack.c.bf16 %v1289_v35, %v1286_v33 }
 0x263   :  { %v3369_v38 = vpop.eup %3368 }
 0x264   :  { %v819_v39 = vadd.f32 1.0, %v3369_v38  ;;  %v3371_v42 = vpop.eup %3370  ;;  %v1293_v38 = vld [vmem:[#allocation8 + $0x98] sm:$0xff] }
 0x265   :  { %v826_v45 = vadd.f32 1.0, %v3371_v42 }
 0x266   :  { %3372 = vrcp.f32 %v819_v39  ;;  %v1296_v39 = vld [vmem:[#allocation8 + $0xb0] sm:$0xff] }
 0x267   :  { %3374 = vrcp.f32 %v826_v45  ;;  %v3998_v42 = vpack.c.bf16 %v1296_v39, %v1293_v38  ;;  %v1292_v45 = vld [vmem:[#allocation8 + $0x90] sm:$0xff] }
 0x270   :  { %v3373_v46 = vpop.eup %3372 }
 0x271   :  { %v830_v48 = vmul.f32 %v3373_v46, %v829_v32  ;;  %v3375_v54 = vpop.eup %3374  ;;  %v1295_v32 = vld [vmem:[#allocation8 + $0xa8] sm:$0xff]  ;;  %v1294_v46 = vld [vmem:[#allocation8 + $0xa0] sm:$0xff] }
 0x272   :  { %v833_v57 = vsub.f32 1.0, %v3375_v54  ;;  %v835_v63 = vmul.f32 %v3375_v54, %v3883_v22 }
 0x273   :  { %v831_v49 = vadd.f32 %v830_v48, %v3857_v7  ;;  %v4000_v48 = vpack.c.bf16 %v1295_v32, %v1292_v45 }
 0x275   :  { %3376 = vtanh.f32 %v831_v49  ;;  %v1297_v49 = vld [vmem:[#allocation8 + $0xb8] sm:$0xff] }
 0x276   :  { %v4003_v54 = vpack.c.bf16 %v1297_v49, %v1294_v46 }
 0x27f   :  { %v3377_v58 = vpop.eup %3376 }
 0x280   :  { %v834_v60 = vmul.f32 %v3377_v58, %v833_v57  ;;  %v1299_v57 = vld [vmem:[#allocation8 + $0xc8] sm:$0xff]  ;;  %v1302_v58 = vld [vmem:[#allocation8 + $0xe0] sm:$0xff] }
 0x282   :  { %v836_v1 = vadd.f32 %v835_v63, %v834_v60  ;;  %v4007_v60 = vpack.c.bf16 %v1302_v58, %v1299_v57  ;;  %v1298_v63 = vld [vmem:[#allocation8 + $0xc0] sm:$0xff] }
 0x284   :  { %838 = vst [vmem:[#allocation11 + $0x8] sm:$0xff] %v836_v1  ;;  %955 = vmatmul.mubr.f32.vlgmr.msra.gmra.mrb[4].mxu0 %v836_v1  ;;  %2597 = vmatmul.mubr.f32.vlgmr.msra.gmra.mrb[12].mxu1 %v836_v1 }
 0x285   :  { %3012 = vmatpush1.bf16.msra.mxu0 %v3712_v41  ;;  %3043 = vmatpush3.bf16.msra.mxu1 %v3733_v4 }
 0x286   :  { %3014 = vmatprep.subr.bf16.mxu0 %v3715_v44  ;;  %3044 = vmatprep.subr.bf16.mxu1 %v3592_v5 }
 0x287   :  { %1170 = vmatprep.mubr.f32.mxu0 %v3591_v0  ;;  %2631 = vmatprep.mubr.msk.f32.mxu1 %vm3593_vm1, %v3591_v0 }
 0x289   :  { %3016 = vmatpush1.bf16.msra.mxu0 %v3720_v52  ;;  %3046 = vmatpush3.bf16.msra.mxu1 %v3746_v15 }
 0x28a   :  { %3018 = vmatprep.subr.bf16.mxu0 %v3723_v53  ;;  %3047 = vmatprep.subr.bf16.mxu1 %v3592_v5 }
 0x28d   :  { %3020 = vmatpush1.bf16.msra.mxu0 %v3728_v61  ;;  %3049 = vmatpush3.bf16.msra.mxu1 %v3760_v25 }
 0x28e   :  { %3022 = vmatprep.subr.bf16.mxu0 %v3731_v62  ;;  %3050 = vmatprep.subr.bf16.mxu1 %v3592_v5 }
 0x291   :  { %3024 = vmatpush1.bf16.msra.mxu0 %v3739_v9  ;;  %3052 = vmatpush3.bf16.msra.mxu1 %v3774_v37 }
 0x292   :  { %3026 = vmatprep.subr.bf16.mxu0 %v3742_v10  ;;  %3053 = vmatprep.subr.bf16.mxu1 %v3592_v5 }
 0x295   :  { %3028 = vmatpush1.bf16.msra.mxu0 %v3753_v19  ;;  %3055 = vmatpush3.bf16.msra.mxu1 %v3788_v47 }
 0x296   :  { %3030 = vmatprep.subr.bf16.mxu0 %v3756_v20  ;;  %3056 = vmatprep.subr.bf16.mxu1 %v3592_v5 }
 0x299   :  { %3032 = vmatpush1.bf16.msra.mxu0 %v3767_v29  ;;  %3058 = vmatpush3.bf16.msra.mxu1 %v3800_v51 }
 0x29a   :  { %3034 = vmatprep.subr.bf16.mxu0 %v3770_v31  ;;  %3059 = vmatprep.subr.bf16.mxu1 %v3592_v5 }
 0x29d   :  { %3036 = vmatpush1.bf16.msra.mxu0 %v3781_v40  ;;  %3061 = vmatpush3.bf16.msra.mxu1 %v3808_v56 }
 0x29e   :  { %3038 = vmatprep.subr.bf16.mxu0 %v3784_v43  ;;  %3062 = vmatprep.subr.bf16.mxu1 %v3592_v5 }
 0x2a1   :  { %3040 = vmatpush1.bf16.msra.mxu0 %v3796_v50  ;;  %3064 = vmatpush3.bf16.msra.mxu1 %v3816_v59 }
 0x2a2   :  { %3097 = vmatprep.subr.bf16.mxu1 %v3592_v5 }
 0x357   :  { %v956_v41 = vpop.f32.mrb[4].mxu0  ;;  %v1027_v44 = vpop.f32.mrb[12].mxu1 }
 0x358   :  { %v3317_v52 = vadd.f32 %v956_v41, %v3871_v30  ;;  %v958_v53 = vpop.f32.mrb[5].mxu0  ;;  %v2598_v61 = vpop.f32.mrb[13].mxu1  ;;  %v1045_v37 = vadd.f32 %v3880_v55, %v1027_v44  ;;  %v1300_v41 = vld [vmem:[#allocation8 + $0xd0] sm:$0xff] }
 0x359   :  { %v3318_v9 = vadd.f32 %v958_v53, %v3873_v34  ;;  %v1305_v61 = vld [vmem:[#allocation8 + $0xf8] sm:$0xff] }
 0x35a   :  { %v2284_v62 = vmul.f32 -1.442695, %v3317_v52  ;;  %v1303_v52 = vld [vmem:[#allocation8 + $0xe8] sm:$0xff] }
 0x35b   :  { %v2285_v10 = vmul.f32 -1.442695, %v3318_v9  ;;  %v4013_v53 = vpack.c.bf16 %v1303_v52, %v1300_v41  ;;  %v1304_v9 = vld [vmem:[#allocation8 + $0xf0] sm:$0xff] }
 0x35c   :  { %3378 = vpow2.f32 %v2284_v62  ;;  %v1308_v62 = vld [vmem:[#allocation8 + $0x110] sm:$0xff] }
 0x35d   :  { %3380 = vpow2.f32 %v2285_v10  ;;  %v4017_v10 = vpack.c.bf16 %v1308_v62, %v1305_v61 }
 0x366   :  { %v3379_v19 = vpop.eup %3378 }
 0x367   :  { %v1035_v20 = vadd.f32 1.0, %v3379_v19  ;;  %v3381_v29 = vpop.eup %3380  ;;  %v1307_v19 = vld [vmem:[#allocation8 + $0x108] sm:$0xff] }
 0x368   :  { %v1042_v31 = vadd.f32 1.0, %v3381_v29  ;;  %v1309_v29 = vld [vmem:[#allocation8 + $0x118] sm:$0xff] }
 0x369   :  { %3382 = vrcp.f32 %v1035_v20  ;;  %v1306_v20 = vld [vmem:[#allocation8 + $0x100] sm:$0xff] }
 0x36a   :  { %3384 = vrcp.f32 %v1042_v31  ;;  %v4020_v31 = vpack.c.bf16 %v1307_v19, %v1304_v9 }
 0x373   :  { %v3383_v40 = vpop.eup %3382 }
 0x374   :  { %v1046_v43 = vmul.f32 %v3383_v40, %v1045_v37  ;;  %v3385_v50 = vpop.eup %3384  ;;  %v4022_v37 = vpack.c.bf16 %v1309_v29, %v1306_v20  ;;  %v1311_v40 = vld [vmem:[#allocation8 + $0x128] sm:$0xff] }
 0x375   :  { %v1049_v51 = vsub.f32 1.0, %v3385_v50  ;;  %v1051_v7 = vmul.f32 %v3385_v50, %v836_v1  ;;  %v1301_v1 = vld [vmem:[#allocation8 + $0xd8] sm:$0xff] }
 0x376   :  { %v1047_v47 = vadd.f32 %v1046_v43, %v3861_v14  ;;  %v1275_v14 = vld [vmem:[#allocation8 + $0x8] sm:$0xff]  ;;  %v4010_v44 = vpack.c.bf16 %v1301_v1, %v1298_v63  ;;  %v1314_v43 = vld [vmem:[#allocation8 + $0x140] sm:$0xff] }
 0x377   :  { %v3980_v11 = vpack.c.bf16 %v1278_v6, %v1275_v14  ;;  %v4025_v50 = vpack.c.bf16 %v1314_v43, %v1311_v40  ;;  %v1317_v14 = vld [vmem:[#allocation8 + $0x158] sm:$0xff]  ;;  %v1320_v6 = vld [vmem:[#allocation8 + $0x170] sm:$0xff] }
 0x378   :  { %3386 = vtanh.f32 %v1047_v47  ;;  %v1310_v47 = vld [vmem:[#allocation8 + $0x120] sm:$0xff] }
 0x379   :  { %3066 = vmatprep.subr.bf16.mxu0 %v3980_v11 }
 0x382   :  { %v3387_v56 = vpop.eup %3386 }
 0x383   :  { %v1050_v59 = vmul.f32 %v3387_v56, %v1049_v51  ;;  %v1313_v51 = vld [vmem:[#allocation8 + $0x138] sm:$0xff]  ;;  %v1312_v56 = vld [vmem:[#allocation8 + $0x130] sm:$0xff] }
 0x385   :  { %v3966_v2 = vadd.f32 %v1051_v7, %v1050_v59  ;;  %v1315_v59 = vld [vmem:[#allocation8 + $0x148] sm:$0xff]  ;;  %v4028_v7 = vpack.c.bf16 %v1313_v51, %v1310_v47  ;;  %v1498_v51 = vld [vmem:[#allocation8 + $0x40] sm:$0xff] }
 0x387   :  { %1054 = vst [vmem:[#allocation11 + $0x10] sm:$0xff] %v3966_v2  ;;  %1171 = vmatmul.mubr.f32.vlgmr.msra.gmra.mrb[6].mxu0 %v3966_v2  ;;  %2632 = vmatmul.mubr.f32.vlgmr.msra.gmra.mrb[14].mxu1 %v3966_v2 }
 0x388   :  { %3099 = vmatpush3.bf16.msra.mxu1 %v3733_v4  ;;  %1386 = vmatprep.mubr.f32.mxu0 %v3591_v0  ;;  %v1274_v4 = vld [vmem:[#allocation8] sm:$0xff] }
 0x389   :  { %3100 = vmatprep.subr.bf16.mxu1 %v3592_v5  ;;  %2666 = vmatprep.mubr.msk.f32.mxu1 %vm3593_vm1, %v3591_v0  ;;  %v3982_v16 = vpack.c.bf16 %v1277_v13, %v1274_v4  ;;  %v4032_v4 = vpack.c.bf16 %v1315_v59, %v1312_v56  ;;  %v4034_v13 = vpack.c.bf16 %v1320_v6, %v1317_v14  ;;  %v1501_v56 = vld [vmem:[#allocation8 + $0x58] sm:$0xff]  ;;  %v1504_v14 = vld [vmem:[#allocation8 + $0x70] sm:$0xff]  ;;  %v1507_v6 = vld [vmem:[#allocation8 + $0x88] sm:$0xff] }
 0x38a   :  { %v4082_v59 = vpack.c.bf16 %v1501_v56, %v1498_v51 }
 0x38b   :  { %3068 = vmatpush1.bf16.msra.mxu0 %v3982_v16 }
 0x38c   :  { %3102 = vmatpush3.bf16.msra.mxu1 %v3746_v15  ;;  %v1284_v15 = vld [vmem:[#allocation8 + $0x50] sm:$0xff] }
 0x38d   :  { %3103 = vmatprep.subr.bf16.mxu1 %v3592_v5  ;;  %v3986_v22 = vpack.c.bf16 %v1284_v15, %v1281_v18  ;;  %v1316_v18 = vld [vmem:[#allocation8 + $0x150] sm:$0xff]  ;;  %v1319_v15 = vld [vmem:[#allocation8 + $0x168] sm:$0xff] }
 0x38e   :  { %v4038_v24 = vpack.c.bf16 %v1319_v15, %v1316_v18  ;;  %v4086_v18 = vpack.c.bf16 %v1507_v6, %v1504_v14 }
 0x38f   :  { %3070 = vmatprep.subr.bf16.mxu0 %v3986_v22 }
 0x390   :  { %3105 = vmatpush3.bf16.msra.mxu1 %v3760_v25  ;;  %v1283_v25 = vld [vmem:[#allocation8 + $0x48] sm:$0xff] }
 0x391   :  { %3106 = vmatprep.subr.bf16.mxu1 %v3592_v5  ;;  %v3988_v8 = vpack.c.bf16 %v1283_v25, %v1280_v3  ;;  %v1318_v3 = vld [vmem:[#allocation8 + $0x160] sm:$0xff]  ;;  %v1321_v25 = vld [vmem:[#allocation8 + $0x178] sm:$0xff] }
 0x392   :  { %v4042_v27 = vpack.c.bf16 %v1321_v25, %v1318_v3 }
 0x393   :  { %3072 = vmatpush1.bf16.msra.mxu0 %v3988_v8 }
 0x394   :  { %3074 = vmatprep.subr.bf16.mxu0 %v3992_v28  ;;  %3108 = vmatpush3.bf16.msra.mxu1 %v4003_v54 }
 0x395   :  { %3109 = vmatprep.subr.bf16.mxu1 %v3592_v5 }
 0x397   :  { %3076 = vmatpush1.bf16.msra.mxu0 %v3994_v36 }
 0x398   :  { %3078 = vmatprep.subr.bf16.mxu0 %v3998_v42  ;;  %3111 = vmatpush3.bf16.msra.mxu1 %v4013_v53 }
 0x399   :  { %3112 = vmatprep.subr.bf16.mxu1 %v3592_v5 }
 0x39b   :  { %3080 = vmatpush1.bf16.msra.mxu0 %v4000_v48 }
 0x39c   :  { %3082 = vmatprep.subr.bf16.mxu0 %v4007_v60  ;;  %3114 = vmatpush3.bf16.msra.mxu1 %v4022_v37 }
 0x39d   :  { %3115 = vmatprep.subr.bf16.mxu1 %v3592_v5 }
 0x39f   :  { %3084 = vmatpush1.bf16.msra.mxu0 %v4010_v44 }
 0x3a0   :  { %3086 = vmatprep.subr.bf16.mxu0 %v4017_v10  ;;  %3117 = vmatpush3.bf16.msra.mxu1 %v4032_v4 }
 0x3a1   :  { %3118 = vmatprep.subr.bf16.mxu1 %v3592_v5 }
 0x3a3   :  { %3088 = vmatpush1.bf16.msra.mxu0 %v4020_v31 }
 0x3a4   :  { %3090 = vmatprep.subr.bf16.mxu0 %v4025_v50  ;;  %3120 = vmatpush3.bf16.msra.mxu1 %v4042_v27 }
 0x3a5   :  { %3153 = vmatprep.subr.bf16.mxu1 %v3592_v5 }
 0x3a7   :  { %3092 = vmatpush1.bf16.msra.mxu0 %v4028_v7 }
 0x3a8   :  { %3094 = vmatprep.subr.bf16.mxu0 %v4034_v13 }
 0x3ab   :  { %3096 = vmatpush1.bf16.msra.mxu0 %v4038_v24 }
 0x3ac   :  { %3122 = vmatprep.subr.bf16.mxu0 %v3980_v11 }
 0x45a   :  { %v1172_v33 = vpop.f32.mrb[6].mxu0  ;;  %v1243_v35 = vpop.f32.mrb[14].mxu1 }
 0x45b   :  { %v3319_v38 = vadd.f32 %v1172_v33, %v3871_v30  ;;  %v1174_v39 = vpop.f32.mrb[7].mxu0  ;;  %v2633_v45 = vpop.f32.mrb[15].mxu1  ;;  %v1261_v41 = vadd.f32 %v3880_v55, %v1243_v35 }
 0x45c   :  { %v3320_v46 = vadd.f32 %v1174_v39, %v3873_v34 }
 0x45d   :  { %v2286_v32 = vmul.f32 -1.442695, %v3319_v38 }
 0x45e   :  { %v2287_v49 = vmul.f32 -1.442695, %v3320_v46 }
 0x45f   :  { %3388 = vpow2.f32 %v2286_v32 }
 0x460   :  { %3390 = vpow2.f32 %v2287_v49 }
 0x469   :  { %v3389_v57 = vpop.eup %3388 }
 0x46a   :  { %v1251_v58 = vadd.f32 1.0, %v3389_v57  ;;  %v3391_v63 = vpop.eup %3390 }
 0x46b   :  { %v1258_v1 = vadd.f32 1.0, %v3391_v63 }
 0x46c   :  { %3392 = vrcp.f32 %v1251_v58 }
 0x46d   :  { %3394 = vrcp.f32 %v1258_v1 }
 0x476   :  { %v3393_v52 = vpop.eup %3392 }
 0x477   :  { %v1262_v61 = vmul.f32 %v3393_v52, %v1261_v41  ;;  %v3395_v9 = vpop.eup %3394 }
 0x478   :  { %v1265_v19 = vsub.f32 1.0, %v3395_v9  ;;  %v1267_v40 = vmul.f32 %v3395_v9, %v3966_v2  ;;  %v1495_v2 = vld [vmem:[#allocation8 + $0x28] sm:$0xff] }
 0x479   :  { %v1263_v62 = vadd.f32 %v1262_v61, %v3859_v12  ;;  %v1492_v12 = vld [vmem:[#allocation8 + $0x10] sm:$0xff] }
 0x47a   :  { %v4078_v47 = vpack.c.bf16 %v1495_v2, %v1492_v12 }
 0x47b   :  { %3396 = vtanh.f32 %v1263_v62 }
 0x485   :  { %v3397_v20 = vpop.eup %3396 }
 0x486   :  { %v1266_v29 = vmul.f32 %v3397_v20, %v1265_v19 }
 0x488   :  { %v4054_v43 = vadd.f32 %v1267_v40, %v1266_v29 }
 0x48a   :  { %1270 = vst [vmem:[#allocation11 + $0x18] sm:$0xff] %v4054_v43  ;;  %1387 = vmatmul.mubr.f32.vlgmr.msra.gmra.mrb[8].mxu0 %v4054_v43  ;;  %2667 = vmatmul.mubr.f32.vlgmr.msra.gmra.mrb[16].mxu1 %v4054_v43 }
 0x48b   :  { %3124 = vmatpush1.bf16.msra.mxu0 %v3982_v16  ;;  %1602 = vmatprep.mubr.f32.mxu0 %v3591_v0 }
 0x48c   :  { %3126 = vmatprep.subr.bf16.mxu0 %v3986_v22  ;;  %2701 = vmatprep.mubr.msk.f32.mxu1 %vm3593_vm1, %v3591_v0 }
 0x48d   :  { %3155 = vmatpush3.bf16.msra.mxu1 %v4078_v47 }
 0x48e   :  { %3156 = vmatprep.subr.bf16.mxu1 %v3592_v5 }
 0x48f   :  { %3128 = vmatpush1.bf16.msra.mxu0 %v3988_v8 }
 0x490   :  { %3130 = vmatprep.subr.bf16.mxu0 %v3992_v28 }
 0x491   :  { %3158 = vmatpush3.bf16.msra.mxu1 %v4082_v59 }
 0x492   :  { %3159 = vmatprep.subr.bf16.mxu1 %v3592_v5 }
 0x493   :  { %3132 = vmatpush1.bf16.msra.mxu0 %v3994_v36 }
 0x494   :  { %3134 = vmatprep.subr.bf16.mxu0 %v3998_v42 }
 0x495   :  { %3161 = vmatpush3.bf16.msra.mxu1 %v4086_v18 }
 0x496   :  { %3162 = vmatprep.subr.bf16.mxu1 %v3592_v5 }
 0x497   :  { %3136 = vmatpush1.bf16.msra.mxu0 %v4000_v48 }
 0x498   :  { %3138 = vmatprep.subr.bf16.mxu0 %v4007_v60 }
 0x499   :  { %3164 = vmatpush3.bf16.msra.mxu1 %v4003_v54 }
 0x49a   :  { %3165 = vmatprep.subr.bf16.mxu1 %v3592_v5 }
 0x49b   :  { %3140 = vmatpush1.bf16.msra.mxu0 %v4010_v44 }
 0x49c   :  { %3142 = vmatprep.subr.bf16.mxu0 %v4017_v10 }
 0x49d   :  { %3167 = vmatpush3.bf16.msra.mxu1 %v4013_v53 }
 0x49e   :  { %3168 = vmatprep.subr.bf16.mxu1 %v3592_v5 }
 0x49f   :  { %3144 = vmatpush1.bf16.msra.mxu0 %v4020_v31 }
 0x4a0   :  { %3146 = vmatprep.subr.bf16.mxu0 %v4025_v50 }
 0x4a1   :  { %3170 = vmatpush3.bf16.msra.mxu1 %v4022_v37 }
 0x4a2   :  { %3171 = vmatprep.subr.bf16.mxu1 %v3592_v5 }
 0x4a3   :  { %3148 = vmatpush1.bf16.msra.mxu0 %v4028_v7 }
 0x4a4   :  { %3150 = vmatprep.subr.bf16.mxu0 %v4034_v13 }
 0x4a5   :  { %3173 = vmatpush3.bf16.msra.mxu1 %v4032_v4 }
 0x4a6   :  { %3174 = vmatprep.subr.bf16.mxu1 %v3592_v5 }
 0x4a7   :  { %3152 = vmatpush1.bf16.msra.mxu0 %v4038_v24 }
 0x4a8   :  { %3178 = vmatprep.subr.bf16.mxu0 %v3980_v11 }
 0x4a9   :  { %3176 = vmatpush3.bf16.msra.mxu1 %v4042_v27 }
 0x4aa   :  { %3209 = vmatprep.subr.bf16.mxu1 %v3592_v5 }
 0x55d   :  { %v1388_v15 = vpop.f32.mrb[8].mxu0  ;;  %v1459_v3 = vpop.f32.mrb[16].mxu1 }
 0x55e   :  { %v3321_v25 = vadd.f32 %v1388_v15, %v3871_v30  ;;  %v1390_v33 = vpop.f32.mrb[9].mxu0  ;;  %v2668_v35 = vpop.f32.mrb[17].mxu1  ;;  %v1477_v58 = vadd.f32 %v3880_v55, %v1459_v3 }
 0x55f   :  { %v3322_v39 = vadd.f32 %v1390_v33, %v3873_v34 }
 0x560   :  { %v2288_v38 = vmul.f32 -1.442695, %v3321_v25 }
 0x561   :  { %v2289_v45 = vmul.f32 -1.442695, %v3322_v39 }
 0x562   :  { %3398 = vpow2.f32 %v2288_v38 }
 0x563   :  { %3400 = vpow2.f32 %v2289_v45 }
 0x56c   :  { %v3399_v32 = vpop.eup %3398 }
 0x56d   :  { %v1467_v46 = vadd.f32 1.0, %v3399_v32  ;;  %v3401_v49 = vpop.eup %3400 }
 0x56e   :  { %v1474_v57 = vadd.f32 1.0, %v3401_v49 }
 0x56f   :  { %3402 = vrcp.f32 %v1467_v46 }
 0x570   :  { %3404 = vrcp.f32 %v1474_v57  ;;  %v2138_v57 = vld [vmem:[#allocation9 + $0x18] sm:$0xff] }
 0x579   :  { %v3403_v63 = vpop.eup %3402 }
 0x57a   :  { %v1478_v1 = vmul.f32 %v3403_v63, %v1477_v58  ;;  %v3405_v52 = vpop.eup %3404  ;;  %v2139_v63 = vld [vmem:[#allocation9 + $0x20] sm:$0xff] }
 0x57b   :  { %v1481_v61 = vsub.f32 1.0, %v3405_v52  ;;  %v1483_v19 = vmul.f32 %v3405_v52, %v4054_v43  ;;  %v2141_v52 = vld [vmem:[#allocation9 + $0x30] sm:$0xff] }
 0x57c   :  { %v1479_v41 = vadd.f32 %v1478_v1, %v3865_v21  ;;  %v2140_v1 = vld [vmem:[#allocation9 + $0x28] sm:$0xff] }
 0x57e   :  { %3406 = vtanh.f32 %v1479_v41  ;;  %v3296_v41 = vpack.c.bf16 %v2140_v1, %v2139_v63 }
 0x588   :  { %v3407_v62 = vpop.eup %3406 }
 0x589   :  { %v1482_v9 = vmul.f32 %v3407_v62, %v1481_v61  ;;  %v2143_v62 = vld [vmem:[#allocation9 + $0x40] sm:$0xff] }
 0x58b   :  { %v4105_v20 = vadd.f32 %v1483_v19, %v1482_v9  ;;  %v2144_v9 = vld [vmem:[#allocation9 + $0x48] sm:$0xff] }
 0x58c   :  { %v3302_v19 = vpack.c.bf16 %v2144_v9, %v2143_v62 }
 0x58d   :  { %1486 = vst [vmem:[#allocation11 + $0x20] sm:$0xff] %v4105_v20  ;;  %1603 = vmatmul.mubr.f32.vlgmr.msra.gmra.mrb[10].mxu0 %v4105_v20  ;;  %2702 = vmatmul.mubr.f32.vlgmr.msra.gmra.mrb[18].mxu1 %v4105_v20 }
 0x58e   :  { %3180 = vmatpush1.bf16.msra.mxu0 %v3982_v16  ;;  %3211 = vmatpush3.bf16.msra.mxu1 %v4078_v47 }
 0x58f   :  { %3182 = vmatprep.subr.bf16.mxu0 %v3986_v22  ;;  %3212 = vmatprep.subr.bf16.mxu1 %v3592_v5 }
 0x590   :  { %1818 = vmatprep.mubr.f32.mxu0 %v3591_v0  ;;  %2736 = vmatprep.mubr.msk.f32.mxu1 %vm3593_vm1, %v3591_v0 }
 0x592   :  { %3184 = vmatpush1.bf16.msra.mxu0 %v3988_v8  ;;  %3214 = vmatpush3.bf16.msra.mxu1 %v4082_v59 }
 0x593   :  { %3186 = vmatprep.subr.bf16.mxu0 %v3992_v28  ;;  %3215 = vmatprep.subr.bf16.mxu1 %v3592_v5 }
 0x596   :  { %3188 = vmatpush1.bf16.msra.mxu0 %v3994_v36  ;;  %3217 = vmatpush3.bf16.msra.mxu1 %v4086_v18 }
 0x597   :  { %3190 = vmatprep.subr.bf16.mxu0 %v3998_v42  ;;  %3218 = vmatprep.subr.bf16.mxu1 %v3592_v5 }
 0x59a   :  { %3192 = vmatpush1.bf16.msra.mxu0 %v4000_v48  ;;  %3220 = vmatpush3.bf16.msra.mxu1 %v4003_v54 }
 0x59b   :  { %3194 = vmatprep.subr.bf16.mxu0 %v4007_v60  ;;  %3221 = vmatprep.subr.bf16.mxu1 %v3592_v5 }
 0x59e   :  { %3196 = vmatpush1.bf16.msra.mxu0 %v4010_v44  ;;  %3223 = vmatpush3.bf16.msra.mxu1 %v4013_v53 }
 0x59f   :  { %3198 = vmatprep.subr.bf16.mxu0 %v4017_v10  ;;  %3224 = vmatprep.subr.bf16.mxu1 %v3592_v5 }
 0x5a2   :  { %3200 = vmatpush1.bf16.msra.mxu0 %v4020_v31  ;;  %3226 = vmatpush3.bf16.msra.mxu1 %v4022_v37 }
 0x5a3   :  { %3202 = vmatprep.subr.bf16.mxu0 %v4025_v50  ;;  %3227 = vmatprep.subr.bf16.mxu1 %v3592_v5 }
 0x5a6   :  { %3204 = vmatpush1.bf16.msra.mxu0 %v4028_v7  ;;  %3229 = vmatpush3.bf16.msra.mxu1 %v4032_v4 }
 0x5a7   :  { %3206 = vmatprep.subr.bf16.mxu0 %v4034_v13  ;;  %3230 = vmatprep.subr.bf16.mxu1 %v3592_v5 }
 0x5aa   :  { %3208 = vmatpush1.bf16.msra.mxu0 %v4038_v24  ;;  %3232 = vmatpush3.bf16.msra.mxu1 %v4042_v27 }
 0x5ab   :  { %3234 = vmatprep.subr.bf16.mxu0 %v3980_v11  ;;  %3265 = vmatprep.subr.bf16.mxu1 %v3592_v5 }
 0x660   :  { %v1604_v21 = vpop.f32.mrb[10].mxu0  ;;  %v1675_v29 = vpop.f32.mrb[18].mxu1 }
 0x661   :  { %v3323_v40 = vadd.f32 %v1604_v21, %v3871_v30  ;;  %v1606_v43 = vpop.f32.mrb[11].mxu0  ;;  %v2703_v12 = vpop.f32.mrb[19].mxu1  ;;  %v1693_v11 = vadd.f32 %v3880_v55, %v1675_v29  ;;  %v2146_v21 = vld [vmem:[#allocation9 + $0x58] sm:$0xff] }
 0x662   :  { %v3324_v51 = vadd.f32 %v1606_v43, %v3873_v34  ;;  %v2148_v43 = vld [vmem:[#allocation9 + $0x68] sm:$0xff] }
 0x663   :  { %v2290_v2 = vmul.f32 -1.442695, %v3323_v40  ;;  %v2147_v40 = vld [vmem:[#allocation9 + $0x60] sm:$0xff] }
 0x664   :  { %v2291_v56 = vmul.f32 -1.442695, %v3324_v51  ;;  %v3308_v12 = vpack.c.bf16 %v2148_v43, %v2147_v40  ;;  %v2150_v51 = vld [vmem:[#allocation9 + $0x78] sm:$0xff] }
 0x665   :  { %3408 = vpow2.f32 %v2290_v2  ;;  %v2149_v2 = vld [vmem:[#allocation9 + $0x70] sm:$0xff] }
 0x666   :  { %3410 = vpow2.f32 %v2291_v56  ;;  %v3311_v56 = vpack.c.bf16 %v2150_v51, %v2149_v2 }
 0x66f   :  { %v3409_v14 = vpop.eup %3408 }
 0x670   :  { %v1683_v6 = vadd.f32 1.0, %v3409_v14  ;;  %v3411_v15 = vpop.eup %3410 }
 0x671   :  { %v1690_v3 = vadd.f32 1.0, %v3411_v15 }
 0x672   :  { %3412 = vrcp.f32 %v1683_v6 }
 0x673   :  { %3414 = vrcp.f32 %v1690_v3 }
 0x67c   :  { %v3413_v25 = vpop.eup %3412 }
 0x67d   :  { %v1694_v33 = vmul.f32 %v3413_v25, %v1693_v11  ;;  %v3415_v38 = vpop.eup %3414 }
 0x67e   :  { %v1697_v39 = vsub.f32 1.0, %v3415_v38  ;;  %v1699_v46 = vmul.f32 %v3415_v38, %v4105_v20  ;;  %v2145_v20 = vld [vmem:[#allocation9 + $0x50] sm:$0xff] }
 0x67f   :  { %v1695_v35 = vadd.f32 %v1694_v33, %v3863_v17  ;;  %v3305_v29 = vpack.c.bf16 %v2146_v21, %v2145_v20 }
 0x681   :  { %3416 = vtanh.f32 %v1695_v35 }
 0x68b   :  { %v3417_v45 = vpop.eup %3416 }
 0x68c   :  { %v1698_v32 = vmul.f32 %v3417_v45, %v1697_v39 }
 0x68e   :  { %v1700_v49 = vadd.f32 %v1699_v46, %v1698_v32 }
 0x690   :  { %1702 = vst [vmem:[#allocation11 + $0x28] sm:$0xff] %v1700_v49  ;;  %1819 = vmatmul.mubr.f32.vlgmr.msra.gmra.mrb[12].mxu0 %v1700_v49  ;;  %2737 = vmatmul.mubr.f32.vlgmr.msra.gmra.mrb[20].mxu1 %v1700_v49 }
 0x691   :  { %3236 = vmatpush1.bf16.msra.mxu0 %v3982_v16  ;;  %3267 = vmatpush3.bf16.msra.mxu1 %v4078_v47 }
 0x692   :  { %3238 = vmatprep.subr.bf16.mxu0 %v3986_v22  ;;  %3268 = vmatprep.subr.bf16.mxu1 %v3592_v5 }
 0x693   :  { %2034 = vmatprep.mubr.f32.mxu0 %v3591_v0  ;;  %2771 = vmatprep.mubr.msk.f32.mxu1 %vm3593_vm1, %v3591_v0 }
 0x695   :  { %3240 = vmatpush1.bf16.msra.mxu0 %v3988_v8  ;;  %3270 = vmatpush3.bf16.msra.mxu1 %v4082_v59  ;;  %v2136_v59 = vld [vmem:[#allocation9 + $0x8] sm:$0xff] }
 0x696   :  { %3242 = vmatprep.subr.bf16.mxu0 %v3992_v28  ;;  %3271 = vmatprep.subr.bf16.mxu1 %v3592_v5 }
 0x699   :  { %3244 = vmatpush1.bf16.msra.mxu0 %v3994_v36  ;;  %3273 = vmatpush3.bf16.msra.mxu1 %v4086_v18  ;;  %v2137_v18 = vld [vmem:[#allocation9 + $0x10] sm:$0xff] }
 0x69a   :  { %3246 = vmatprep.subr.bf16.mxu0 %v3998_v42  ;;  %3274 = vmatprep.subr.bf16.mxu1 %v3592_v5  ;;  %v3293_v58 = vpack.c.bf16 %v2138_v57, %v2137_v18 }
 0x69d   :  { %3248 = vmatpush1.bf16.msra.mxu0 %v4000_v48  ;;  %3276 = vmatpush3.bf16.msra.mxu1 %v4003_v54 }
 0x69e   :  { %3250 = vmatprep.subr.bf16.mxu0 %v4007_v60  ;;  %3277 = vmatprep.subr.bf16.mxu1 %v3592_v5 }
 0x6a1   :  { %3252 = vmatpush1.bf16.msra.mxu0 %v4010_v44  ;;  %3279 = vmatpush3.bf16.msra.mxu1 %v4013_v53 }
 0x6a2   :  { %3254 = vmatprep.subr.bf16.mxu0 %v4017_v10  ;;  %3280 = vmatprep.subr.bf16.mxu1 %v3592_v5 }
 0x6a5   :  { %3256 = vmatpush1.bf16.msra.mxu0 %v4020_v31  ;;  %3282 = vmatpush3.bf16.msra.mxu1 %v4022_v37 }
 0x6a6   :  { %3258 = vmatprep.subr.bf16.mxu0 %v4025_v50  ;;  %3283 = vmatprep.subr.bf16.mxu1 %v3592_v5 }
 0x6a9   :  { %3260 = vmatpush1.bf16.msra.mxu0 %v4028_v7  ;;  %3285 = vmatpush3.bf16.msra.mxu1 %v4032_v4 }
 0x6aa   :  { %3262 = vmatprep.subr.bf16.mxu0 %v4034_v13  ;;  %3286 = vmatprep.subr.bf16.mxu1 %v3592_v5 }
 0x6ad   :  { %3264 = vmatpush1.bf16.msra.mxu0 %v4038_v24  ;;  %3288 = vmatpush3.bf16.msra.mxu1 %v4042_v27 }
 0x6ae   :  { %3289 = vmatprep.subr.bf16.mxu0 %v3592_v5 }
 0x763   :  { %v1820_v17 = vpop.f32.mrb[12].mxu0  ;;  %v1891_v16 = vpop.f32.mrb[20].mxu1 }
 0x764   :  { %v3325_v22 = vadd.f32 %v1820_v17, %v3871_v30  ;;  %v1822_v8 = vpop.f32.mrb[13].mxu0  ;;  %v2738_v28 = vpop.f32.mrb[21].mxu1  ;;  %v1909_v10 = vadd.f32 %v3880_v55, %v1891_v16  ;;  %v2135_v55 = vld [vmem:[#allocation9] sm:$0xff] }
 0x765   :  { %v3326_v42 = vadd.f32 %v1822_v8, %v3873_v34 }
 0x766   :  { %v2292_v36 = vmul.f32 -1.442695, %v3325_v22 }
 0x767   :  { %v2293_v48 = vmul.f32 -1.442695, %v3326_v42 }
 0x768   :  { %3418 = vpow2.f32 %v2292_v36 }
 0x769   :  { %3420 = vpow2.f32 %v2293_v48 }
 0x772   :  { %v3419_v54 = vpop.eup %3418 }
 0x773   :  { %v1899_v60 = vadd.f32 1.0, %v3419_v54  ;;  %v3421_v44 = vpop.eup %3420 }
 0x774   :  { %v1906_v53 = vadd.f32 1.0, %v3421_v44 }
 0x775   :  { %3422 = vrcp.f32 %v1899_v60 }
 0x776   :  { %3424 = vrcp.f32 %v1906_v53 }
 0x77f   :  { %v3423_v31 = vpop.eup %3422 }
 0x780   :  { %v1910_v37 = vmul.f32 %v3423_v31, %v1909_v10  ;;  %v3425_v7 = vpop.eup %3424 }
 0x781   :  { %v1913_v4 = vsub.f32 1.0, %v3425_v7  ;;  %v1915_v27 = vmul.f32 %v3425_v7, %v1700_v49 }
 0x782   :  { %v1911_v50 = vadd.f32 %v1910_v37, %v3869_v26  ;;  %v3290_v26 = vpack.c.bf16 %v2136_v59, %v2135_v55 }
 0x784   :  { %3426 = vtanh.f32 %v1911_v50 }
 0x78e   :  { %v3427_v13 = vpop.eup %3426 }
 0x78f   :  { %v1914_v24 = vmul.f32 %v3427_v13, %v1913_v4 }
 0x791   :  { %v4188_v47 = vadd.f32 %v1915_v27, %v1914_v24 }
 0x793   :  { %1918 = vst [vmem:[#allocation11 + $0x30] sm:$0xff] %v4188_v47  ;;  %2035 = vmatmul.mubr.f32.vlgmr.msra.gmra.mrb[14].mxu0 %v4188_v47  ;;  %2772 = vmatmul.mubr.f32.vlgmr.msra.gmra.mrb[22].mxu1 %v4188_v47 }
 0x794   :  { %2806 = vmatprep.mubr.msk.f32.mxu0 %vm3593_vm1, %v3591_v0  ;;  %3291 = vmatpush3.bf16.msra.mxu0 %v3290_v26  ;;  %v2142_v0 = vld [vmem:[#allocation9 + $0x38] sm:$0xff] }
 0x795   :  { %3292 = vmatprep.subr.bf16.mxu0 %v3592_v5  ;;  %v3299_v61 = vpack.c.bf16 %v2142_v0, %v2141_v52 }
 0x798   :  { %3294 = vmatpush3.bf16.msra.mxu0 %v3293_v58 }
 0x799   :  { %3295 = vmatprep.subr.bf16.mxu0 %v3592_v5 }
 0x79c   :  { %3297 = vmatpush3.bf16.msra.mxu0 %v3296_v41 }
 0x79d   :  { %3298 = vmatprep.subr.bf16.mxu0 %v3592_v5 }
 0x7a0   :  { %3300 = vmatpush3.bf16.msra.mxu0 %v3299_v61 }
 0x7a1   :  { %3301 = vmatprep.subr.bf16.mxu0 %v3592_v5 }
 0x7a4   :  { %3303 = vmatpush3.bf16.msra.mxu0 %v3302_v19 }
 0x7a5   :  { %3304 = vmatprep.subr.bf16.mxu0 %v3592_v5 }
 0x7a8   :  { %3306 = vmatpush3.bf16.msra.mxu0 %v3305_v29 }
 0x7a9   :  { %3307 = vmatprep.subr.bf16.mxu0 %v3592_v5 }
 0x7ac   :  { %3309 = vmatpush3.bf16.msra.mxu0 %v3308_v12 }
 0x7ad   :  { %3310 = vmatprep.subr.bf16.mxu0 %v3592_v5  ;;  %v3440_v5 = vld [vmem:[%s4243_s4] ss:$0 sm:$0xff]  ;;  %s3529_s4 = scalar_lea.vmem %s2236_s18, 1024 }
 0x7ae   :  { %p3530_p4 = scmp.ne.s32.totalorder %s2236_s18, %s3529_s4  ;;  %p3535_p6 = scmp.lt.s32.totalorder %s3529_s4, %s3529_s4 }
 0x7b0   :  { %3312 = vmatpush3.bf16.msra.mxu0 %v3311_v56  ;;  %p3536_p7 = por %p3535_p6, %p3534_p5 }
 0x7b2   :  { %p3537_p8 = pnand %p3536_p7, %p3530_p4 }
 0x866   :  { %v2036_v14 = vpop.f32.mrb[14].mxu0  ;;  %v2107_v6 = vpop.f32.mrb[22].mxu1 }
 0x867   :  { %v3327_v15 = vadd.f32 %v2036_v14, %v3871_v30  ;;  %v2038_v3 = vpop.f32.mrb[15].mxu0  ;;  %v2773_v11 = vpop.f32.mrb[23].mxu1  ;;  %v2125_v46 = vadd.f32 %v3440_v5, %v2107_v6 }
 0x868   :  { %v3328_v33 = vadd.f32 %v2038_v3, %v3873_v34 }
 0x869   :  { %v2294_v25 = vmul.f32 -1.442695, %v3327_v15 }
 0x86a   :  { %v2295_v35 = vmul.f32 -1.442695, %v3328_v33 }
 0x86b   :  { %3428 = vpow2.f32 %v2294_v25 }
 0x86c   :  { %3430 = vpow2.f32 %v2295_v35 }
 0x875   :  { %v3429_v38 = vpop.eup %3428 }
 0x876   :  { %v2115_v39 = vadd.f32 1.0, %v3429_v38  ;;  %v3431_v45 = vpop.eup %3430 }
 0x877   :  { %v2122_v32 = vadd.f32 1.0, %v3431_v45 }
 0x878   :  { %3432 = vrcp.f32 %v2115_v39 }
 0x879   :  { %3434 = vrcp.f32 %v2122_v32 }
 0x882   :  { %v3433_v49 = vpop.eup %3432 }
 0x883   :  { %v2126_v30 = vmul.f32 %v3433_v49, %v2125_v46  ;;  %v3435_v34 = vpop.eup %3434 }
 0x884   :  { %v2129_v16 = vsub.f32 1.0, %v3435_v34  ;;  %v2131_v28 = vmul.f32 %v3435_v34, %v4188_v47 }
 0x885   :  { %v2127_v17 = vadd.f32 %v2126_v30, %v3867_v23 }
 0x887   :  { %3436 = vtanh.f32 %v2127_v17 }
 0x891   :  { %v3437_v22 = vpop.eup %3436 }
 0x892   :  { %v2130_v8 = vmul.f32 %v3437_v22, %v2129_v16 }
 0x894   :  { %v2132_v36 = vadd.f32 %v2131_v28, %v2130_v8 }
 0x896   :  { %2134 = vst [vmem:[#allocation11 + $0x38] sm:$0xff] %v2132_v36  ;;  %2807 = vmatmul.mubr.f32.vlgmr.msra.gmra.mrb[16].mxu0 %v2132_v36 }
 0x897   :  { %3540 = shalt.err (!%p3537_p8)
}
 0x898   :  { %s3541_s22 = scalar_lea.hbm %s4246_s7, 1024 }
 0x899   :  { %p3542_p9 = scmp.ne.s32.totalorder %s4246_s7, %s3541_s22  ;;  %p3545_p10 = scmp.lt.u32.totalorder %s3541_s22, %s4246_s7 }
 0x89b   :  { %p3547_p11 = pnand %p3545_p10, %p3542_p9 }
 0x89d   :  { %3550 = shalt.err (!%p3547_p11)
}
 0x89e   :  { %2241 = dma.vmem_to_hbm [thread:$0]  %s2236_s18, 1024, %s4246_s7, [#allocation5], %s3587_s1, %s3587_s1, %s3588_s28  }
 0x89f   :  { %v2296_v23 = vld [vmem:[%s4245_s6] ss:$0 sm:$0xff]  ;;  %s3595_s30 = smov [#allocation12]  }
 0x8a0   :  { %s2248_s9 = sshll.u32 %s3595_s30, 4  ;;  %s2249_s9 = int_to_ptr.vmem [resolvable:$true] %s2248_s9 }
 0x8a1   :  { %s3551_s10 = scalar_lea.vmem %s2249_s9, 128  ;;  %p3556_p13 = scmp.lt.s32.totalorder %s2249_s9, %s2249_s9 }
 0x8a2   :  { %p3552_p12 = scmp.ne.s32.totalorder %s2249_s9, %s3551_s10  ;;  %p3557_p0 = scmp.lt.s32.totalorder %s3551_s10, %s3551_s10 }
 0x8a4   :  { %p3558_p1 = por %p3557_p0, %p3556_p13 }
 0x8a6   :  { %p3559_p2 = pnand %p3558_p1, %p3552_p12 }
 0x969   :  { %v2224_v42 = vpop.f32.mrb[16].mxu0 }
 0x96a   :  { %v2225_v48 = vadd.f32 %v2296_v23, %v2224_v42  ;;  %v2808_v54 = vpop.f32.mrb[17].mxu0 }
 0x96c   :  { %3438 = vtanh.f32 %v2225_v48 }
 0x976   :  { %v3439_v60 = vpop.eup %3438 }
 0x977   :  { %2229 = vst [vmem:[#allocation12] sm:$0xff] %v3439_v60 }
 0x978   :  { %3562 = shalt.err (!%p3559_p2)
}
 0x979   :  { %s3563_s6 = scalar_lea.hbm %s4247_s8, 128 }
 0x97a   :  { %p3564_p3 = scmp.ne.s32.totalorder %s4247_s8, %s3563_s6  ;;  %p3567_p4 = scmp.lt.u32.totalorder %s3563_s6, %s4247_s8 }
 0x97c   :  { %p3569_p5 = pnand %p3567_p4, %p3564_p3 }
 0x97e   :  { %3572 = shalt.err (!%p3569_p5)
}
 0x97f   :  { %2251 = dma.vmem_to_hbm [thread:$0]  %s2249_s9, 128, %s4247_s8, [#allocation13]  }
 0x980   :  { %3579 = dma.done.wait [#allocation5], 1024  }
 0x981   :  { %3580 = vsyncadd [#allocation5], 4294966272 }
 0x982   :  { %3581 = dma.done.wait [#allocation13], 128  }
 0x983   :  { %3582 = vsyncadd [#allocation13], 4294967168 }
 0x984   :  { %2258 = vsyncpa [#allocation4], 1 }
 0x985   :  { %2259 = vsyncpa [#allocation7], 1 }
 0x986   :  { %2260 = vsyncpa [#allocation10], 1 }
 0x987   :  { %2261 = vsyncpa [#allocation5], 1 }
 0x988   :  { %2262 = vsyncpa [#allocation13], 1 }

</bundles_post_ra>
